<compile_context>
chip_gen: v6e
topology: v6e:2x2x1
jax: 0.10.0
libtpu: 0.0.40
codegen_flags: <defaults>
</compile_context>

<pallas_src>
import functools
import math

import jax
import jax.numpy as jnp
from jax.experimental import pallas as pl
from jax.experimental.pallas import tpu as pltpu


def _clip_layer_kernel(x_ref,
                       ln1_g_ref, ln1_b_ref,
                       w_in_ref, b_in_ref,
                       w_out_ref, b_out_ref,
                       ln2_g_ref, ln2_b_ref,
                       w1_ref, b1_ref,
                       w2_ref, b2_ref,
                       out_ref,
                       *, n_head: int, eps: float = 1e-5):
    """One grid step = one batch row: full pre-LN CLIP encoder layer."""
    x = x_ref[0].astype(jnp.float32)               # (S, D)
    S, D = x.shape
    d_head = D // n_head
    scale = 1.0 / math.sqrt(d_head)

    def layer_norm(v, g_ref, b_ref):
        mu = jnp.mean(v, axis=-1, keepdims=True)
        c = v - mu
        var = jnp.mean(c * c, axis=-1, keepdims=True)
        return c * jax.lax.rsqrt(var + eps) * g_ref[...] + b_ref[...]

    # ---- LayerNorm 1 + fused QKV projection (slices are zero-cost ref views) ----
    h = layer_norm(x, ln1_g_ref, ln1_b_ref)        # (S, D)
    q = jnp.dot(h, w_in_ref[:, 0:D],
                preferred_element_type=jnp.float32) + b_in_ref[:, 0:D]
    k = jnp.dot(h, w_in_ref[:, D:2 * D],
                preferred_element_type=jnp.float32) + b_in_ref[:, D:2 * D]
    v = jnp.dot(h, w_in_ref[:, 2 * D:3 * D],
                preferred_element_type=jnp.float32) + b_in_ref[:, 2 * D:3 * D]

    # ---- causal mask: key position j may attend only if j <= query i ----
    qi = jax.lax.broadcasted_iota(jnp.int32, (S, S), 0)
    kj = jax.lax.broadcasted_iota(jnp.int32, (S, S), 1)
    allowed = kj <= qi

    # ---- per-head attention; out_proj folded into the head loop ----
    attn = jnp.zeros((S, D), jnp.float32)
    for hd in range(n_head):                       # static, unrolled (n_head small)
        sl = slice(hd * d_head, (hd + 1) * d_head)
        qh, kh, vh = q[:, sl], k[:, sl], v[:, sl]  # (S, d_head)
        s = jax.lax.dot_general(qh, kh, (((1,), (1,)), ((), ())),
                                preferred_element_type=jnp.float32) * scale  # (S, S)
        s = jnp.where(allowed, s, -1e30)
        s = s - jnp.max(s, axis=-1, keepdims=True)
        p = jnp.exp(s)
        p = p / jnp.sum(p, axis=-1, keepdims=True)
        oh = jnp.dot(p, vh, preferred_element_type=jnp.float32)             # (S, d_head)
        # concat(heads) @ W_out  ==  sum_h  o_h @ W_out[rows of head h]
        attn = attn + jnp.dot(oh, w_out_ref[sl, :],
                              preferred_element_type=jnp.float32)
    attn = attn + b_out_ref[...]

    x1 = x + attn                                  # residual 1

    # ---- LayerNorm 2 + MLP with QuickGELU ----
    h2 = layer_norm(x1, ln2_g_ref, ln2_b_ref)
    m = jnp.dot(h2, w1_ref[...], preferred_element_type=jnp.float32) + b1_ref[...]
    m = m * (1.0 / (1.0 + jnp.exp(-1.702 * m)))    # x * sigmoid(1.702 x)
    m = jnp.dot(m, w2_ref[...], preferred_element_type=jnp.float32) + b2_ref[...]

    out_ref[0] = (x1 + m).astype(out_ref.dtype)    # residual 2


def clip_layer(x, p, n_head):
    B, S, D = x.shape
    inv = lambda b: (0, 0)                          # grid-invariant weight blocks

    grid_spec = pltpu.PrefetchScalarGridSpec(
        num_scalar_prefetch=0,
        grid=(B,),
        in_specs=[
            pl.BlockSpec((1, S, D), lambda b: (b, 0, 0)),                   # x
            pl.BlockSpec((1, D), inv), pl.BlockSpec((1, D), inv),           # ln1 g/b
            pl.BlockSpec((D, 3 * D), inv), pl.BlockSpec((1, 3 * D), inv),   # in_proj W/b
            pl.BlockSpec((D, D), inv), pl.BlockSpec((1, D), inv),           # out_proj W/b
            pl.BlockSpec((1, D), inv), pl.BlockSpec((1, D), inv),           # ln2 g/b
            pl.BlockSpec((D, 4 * D), inv), pl.BlockSpec((1, 4 * D), inv),   # linear_1 W/b
            pl.BlockSpec((4 * D, D), inv), pl.BlockSpec((1, D), inv),       # linear_2 W/b
        ],
        out_specs=pl.BlockSpec((1, S, D), lambda b: (b, 0, 0)),
    )

    kernel = functools.partial(_clip_layer_kernel, n_head=n_head)
    return pl.pallas_call(
        kernel,
        out_shape=jax.ShapeDtypeStruct((B, S, D), x.dtype),
        grid_spec=grid_spec,
        compiler_params=pltpu.CompilerParams(
            dimension_semantics=("parallel",)),
    )(x,
      p["ln1_g"], p["ln1_b"],
      p["w_in"], p["b_in"],
      p["w_out"], p["b_out"],
      p["ln2_g"], p["ln2_b"],
      p["w1"], p["b1"],
      p["w2"], p["b2"])


def clip_layer_ref(x, p, n_head):
    """Pure-JAX mirror of the PyTorch CLIPLayer.forward (causal_mask=True)."""
    B, S, D = x.shape
    d_head = D // n_head

    def ln(v, g, b):
        mu = v.mean(-1, keepdims=True)
        var = ((v - mu) ** 2).mean(-1, keepdims=True)
        return (v - mu) / jnp.sqrt(var + 1e-5) * g + b

    h = ln(x, p["ln1_g"], p["ln1_b"])
    qkv = h @ p["w_in"] + p["b_in"]
    q, k, v = jnp.split(qkv, 3, axis=-1)
    to_heads = lambda t: t.reshape(B, S, n_head, d_head).transpose(0, 2, 1, 3)
    q, k, v = to_heads(q), to_heads(k), to_heads(v)
    s = jnp.einsum("bhqd,bhkd->bhqk", q, k) / math.sqrt(d_head)
    causal = jnp.tril(jnp.ones((S, S), bool))
    s = jnp.where(causal, s, -1e30)
    w = jax.nn.softmax(s, axis=-1)
    o = jnp.einsum("bhqk,bhkd->bhqd", w, v)
    o = o.transpose(0, 2, 1, 3).reshape(B, S, D)
    o = o @ p["w_out"] + p["b_out"]
    x = x + o
    h = ln(x, p["ln2_g"], p["ln2_b"])
    m = h @ p["w1"] + p["b1"]
    m = m * jax.nn.sigmoid(1.702 * m)
    m = m @ p["w2"] + p["b2"]
    return x + m


if __name__ == "__main__":
    # Small CLIP-like shapes: lane-dense D (multiple of 128), seq multiple of 8.
    n_head, n_embd, seq, batch = 4, 128, 16, 2
    D = n_embd

    key = jax.random.PRNGKey(0)
    keys = jax.random.split(key, 13)

    def nrm(k, shape, scale=0.02):
        return scale * jax.random.normal(k, shape, jnp.float32)

    params = dict(
        ln1_g=1.0 + nrm(keys[0], (1, D), 0.1),
        ln1_b=nrm(keys[1], (1, D), 0.1),
        w_in=nrm(keys[2], (D, 3 * D)),
        b_in=nrm(keys[3], (1, 3 * D), 0.1),
        w_out=nrm(keys[4], (D, D)),
        b_out=nrm(keys[5], (1, D), 0.1),
        ln2_g=1.0 + nrm(keys[6], (1, D), 0.1),
        ln2_b=nrm(keys[7], (1, D), 0.1),
        w1=nrm(keys[8], (D, 4 * D)),
        b1=nrm(keys[9], (1, 4 * D), 0.1),
        w2=nrm(keys[10], (4 * D, D)),
        b2=nrm(keys[11], (1, D), 0.1),
    )
    x = jax.random.normal(keys[12], (batch, seq, D), jnp.float32)

    out = clip_layer(x, params, n_head)
    out = jax.block_until_ready(out)

    ref = clip_layer_ref(x, params, n_head)
    assert out.shape == (batch, seq, D)
    assert out.dtype == jnp.float32
    max_err = float(jnp.max(jnp.abs(out - ref)))
    assert jnp.allclose(out, ref, atol=2e-2, rtol=2e-2), f"mismatch: max|diff|={max_err}"

    print("KERNEL_OK")
</pallas_src>

<mosaic_0001>
module attributes {stable_mosaic.version = 11 : i64} {
  func.func @_clip_layer_kernel(%arg0: i32, %arg1: memref<1x16x128xf32, #tpu.memory_space<vmem>>, %arg2: memref<1x128xf32, #tpu.memory_space<vmem>>, %arg3: memref<1x128xf32, #tpu.memory_space<vmem>>, %arg4: memref<128x384xf32, #tpu.memory_space<vmem>>, %arg5: memref<1x384xf32, #tpu.memory_space<vmem>>, %arg6: memref<128x128xf32, #tpu.memory_space<vmem>>, %arg7: memref<1x128xf32, #tpu.memory_space<vmem>>, %arg8: memref<1x128xf32, #tpu.memory_space<vmem>>, %arg9: memref<1x128xf32, #tpu.memory_space<vmem>>, %arg10: memref<128x512xf32, #tpu.memory_space<vmem>>, %arg11: memref<1x512xf32, #tpu.memory_space<vmem>>, %arg12: memref<512x128xf32, #tpu.memory_space<vmem>>, %arg13: memref<1x128xf32, #tpu.memory_space<vmem>>, %arg14: memref<1x16x128xf32, #tpu.memory_space<vmem>>) attributes {dimension_semantics = [#tpu.dimension_semantics<parallel>], iteration_bounds = array<i64: 2>, scalar_prefetch = 0 : i64, scratch_operands = 0 : i64, tpu.core_type = #tpu.core_type<tc>, window_params = [{transform_indices = @transform_0, window_bounds = array<i64: 1, 16, 128>}, {pipeline_mode = #tpu.pipeline_mode<synchronous>, transform_indices = @transform_1, window_bounds = array<i64: 1, 128>}, {pipeline_mode = #tpu.pipeline_mode<synchronous>, transform_indices = @transform_2, window_bounds = array<i64: 1, 128>}, {pipeline_mode = #tpu.pipeline_mode<synchronous>, transform_indices = @transform_3, window_bounds = array<i64: 128, 384>}, {pipeline_mode = #tpu.pipeline_mode<synchronous>, transform_indices = @transform_4, window_bounds = array<i64: 1, 384>}, {pipeline_mode = #tpu.pipeline_mode<synchronous>, transform_indices = @transform_5, window_bounds = array<i64: 128, 128>}, {pipeline_mode = #tpu.pipeline_mode<synchronous>, transform_indices = @transform_6, window_bounds = array<i64: 1, 128>}, {pipeline_mode = #tpu.pipeline_mode<synchronous>, transform_indices = @transform_7, window_bounds = array<i64: 1, 128>}, {pipeline_mode = #tpu.pipeline_mode<synchronous>, transform_indices = @transform_8, window_bounds = array<i64: 1, 128>}, {pipeline_mode = #tpu.pipeline_mode<synchronous>, transform_indices = @transform_9, window_bounds = array<i64: 128, 512>}, {pipeline_mode = #tpu.pipeline_mode<synchronous>, transform_indices = @transform_10, window_bounds = array<i64: 1, 512>}, {pipeline_mode = #tpu.pipeline_mode<synchronous>, transform_indices = @transform_11, window_bounds = array<i64: 512, 128>}, {pipeline_mode = #tpu.pipeline_mode<synchronous>, transform_indices = @transform_12, window_bounds = array<i64: 1, 128>}, {transform_indices = @transform_13, window_bounds = array<i64: 1, 16, 128>}]} {
    %c0 = arith.constant 0 : index
    %c0_0 = arith.constant 0 : index
    %c0_1 = arith.constant 0 : index
    %0 = vector.load %arg1[%c0, %c0_0, %c0_1] : memref<1x16x128xf32, #tpu.memory_space<vmem>>, vector<1x16x128xf32>
    %1 = vector.shape_cast %0 : vector<1x16x128xf32> to vector<16x128xf32>
    %cst = arith.constant dense<0.000000e+00> : vector<16xf32>
    %2 = vector.multi_reduction <add>, %1, %cst [1] : vector<16x128xf32> to vector<16xf32>
    %3 = vector.shape_cast %2 : vector<16xf32> to vector<16x1xf32>
    %cst_2 = arith.constant 1.280000e+02 : f32
    %4 = vector.broadcast %cst_2 : f32 to vector<16x1xf32>
    %5 = arith.divf %3, %4 : vector<16x1xf32>
    %6 = vector.broadcast %5 : vector<16x1xf32> to vector<16x128xf32>
    %7 = arith.subf %1, %6 : vector<16x128xf32>
    %8 = arith.mulf %7, %7 : vector<16x128xf32>
    %cst_3 = arith.constant dense<0.000000e+00> : vector<16xf32>
    %9 = vector.multi_reduction <add>, %8, %cst_3 [1] : vector<16x128xf32> to vector<16xf32>
    %10 = vector.shape_cast %9 : vector<16xf32> to vector<16x1xf32>
    %cst_4 = arith.constant 1.280000e+02 : f32
    %11 = vector.broadcast %cst_4 : f32 to vector<16x1xf32>
    %12 = arith.divf %10, %11 : vector<16x1xf32>
    %cst_5 = arith.constant 9.99999974E-6 : f32
    %13 = vector.broadcast %cst_5 : f32 to vector<16x1xf32>
    %14 = arith.addf %12, %13 : vector<16x1xf32>
    %15 = math.rsqrt %14 : vector<16x1xf32>
    %16 = vector.broadcast %15 : vector<16x1xf32> to vector<16x128xf32>
    %17 = arith.mulf %7, %16 : vector<16x128xf32>
    %c0_6 = arith.constant 0 : index
    %c0_7 = arith.constant 0 : index
    %18 = vector.load %arg2[%c0_6, %c0_7] : memref<1x128xf32, #tpu.memory_space<vmem>>, vector<1x128xf32>
    %19 = vector.broadcast %18 : vector<1x128xf32> to vector<16x128xf32>
    %20 = arith.mulf %17, %19 : vector<16x128xf32>
    %c0_8 = arith.constant 0 : index
    %c0_9 = arith.constant 0 : index
    %21 = vector.load %arg3[%c0_8, %c0_9] : memref<1x128xf32, #tpu.memory_space<vmem>>, vector<1x128xf32>
    %22 = vector.broadcast %21 : vector<1x128xf32> to vector<16x128xf32>
    %23 = arith.addf %20, %22 : vector<16x128xf32>
    %c0_10 = arith.constant 0 : index
    %c0_11 = arith.constant 0 : index
    %24 = vector.load %arg4[%c0_10, %c0_11] : memref<128x384xf32, #tpu.memory_space<vmem>>, vector<128x128xf32>
    %cst_12 = arith.constant dense<0.000000e+00> : vector<16x128xf32>
    %25 = tpu.matmul %23, %24, %cst_12 {dimension_numbers = #tpu.dot_dimension_numbers<[1], [0], [0], [1], [0, 0, 1, 1], [], []>} : vector<16x128xf32>, vector<128x128xf32>, vector<16x128xf32> -> vector<16x128xf32>
    %c0_13 = arith.constant 0 : index
    %c0_14 = arith.constant 0 : index
    %26 = vector.load %arg5[%c0_13, %c0_14] : memref<1x384xf32, #tpu.memory_space<vmem>>, vector<1x128xf32>
    %27 = vector.broadcast %26 : vector<1x128xf32> to vector<16x128xf32>
    %28 = arith.addf %25, %27 : vector<16x128xf32>
    %c0_15 = arith.constant 0 : index
    %c128 = arith.constant 128 : index
    %29 = vector.load %arg4[%c0_15, %c128] : memref<128x384xf32, #tpu.memory_space<vmem>>, vector<128x128xf32>
    %cst_16 = arith.constant dense<0.000000e+00> : vector<16x128xf32>
    %30 = tpu.matmul %23, %29, %cst_16 {dimension_numbers = #tpu.dot_dimension_numbers<[1], [0], [0], [1], [0, 0, 1, 1], [], []>} : vector<16x128xf32>, vector<128x128xf32>, vector<16x128xf32> -> vector<16x128xf32>
    %c0_17 = arith.constant 0 : index
    %c128_18 = arith.constant 128 : index
    %31 = vector.load %arg5[%c0_17, %c128_18] : memref<1x384xf32, #tpu.memory_space<vmem>>, vector<1x128xf32>
    %32 = vector.broadcast %31 : vector<1x128xf32> to vector<16x128xf32>
    %33 = arith.addf %30, %32 : vector<16x128xf32>
    %c0_19 = arith.constant 0 : index
    %c256 = arith.constant 256 : index
    %34 = vector.load %arg4[%c0_19, %c256] : memref<128x384xf32, #tpu.memory_space<vmem>>, vector<128x128xf32>
    %cst_20 = arith.constant dense<0.000000e+00> : vector<16x128xf32>
    %35 = tpu.matmul %23, %34, %cst_20 {dimension_numbers = #tpu.dot_dimension_numbers<[1], [0], [0], [1], [0, 0, 1, 1], [], []>} : vector<16x128xf32>, vector<128x128xf32>, vector<16x128xf32> -> vector<16x128xf32>
    %c0_21 = arith.constant 0 : index
    %c256_22 = arith.constant 256 : index
    %36 = vector.load %arg5[%c0_21, %c256_22] : memref<1x384xf32, #tpu.memory_space<vmem>>, vector<1x128xf32>
    %37 = vector.broadcast %36 : vector<1x128xf32> to vector<16x128xf32>
    %38 = arith.addf %35, %37 : vector<16x128xf32>
    %39 = tpu.iota {dimensions = array<i32: 0>} : vector<16x16xi32>
    %40 = tpu.iota {dimensions = array<i32: 1>} : vector<16x16xi32>
    %41 = arith.cmpi sle, %40, %39 : vector<16x16xi32>
    %cst_23 = arith.constant 0.000000e+00 : f32
    %42 = vector.broadcast %cst_23 : f32 to vector<16x128xf32>
    %43 = vector.extract_strided_slice %28 {offsets = [0, 0], sizes = [16, 32], strides = [1, 1]} : vector<16x128xf32> to vector<16x32xf32>
    %44 = vector.extract_strided_slice %33 {offsets = [0, 0], sizes = [16, 32], strides = [1, 1]} : vector<16x128xf32> to vector<16x32xf32>
    %45 = vector.extract_strided_slice %38 {offsets = [0, 0], sizes = [16, 32], strides = [1, 1]} : vector<16x128xf32> to vector<16x32xf32>
    %cst_24 = arith.constant dense<0.000000e+00> : vector<16x16xf32>
    %46 = tpu.matmul %43, %44, %cst_24 {dimension_numbers = #tpu.dot_dimension_numbers<[1], [1], [0], [0], [0, 0, 1, 0], [], []>} : vector<16x32xf32>, vector<16x32xf32>, vector<16x16xf32> -> vector<16x16xf32>
    %cst_25 = arith.constant 0.176776692 : f32
    %47 = vector.broadcast %cst_25 : f32 to vector<16x16xf32>
    %48 = arith.mulf %46, %47 : vector<16x16xf32>
    %cst_26 = arith.constant -1.000000e+30 : f32
    %49 = vector.broadcast %cst_26 : f32 to vector<16x16xf32>
    %50 = arith.select %41, %48, %49 : vector<16x16xi1>, vector<16x16xf32>
    %cst_27 = arith.constant dense<0xFF800000> : vector<16xf32>
    %51 = vector.multi_reduction <maximumf>, %50, %cst_27 [1] : vector<16x16xf32> to vector<16xf32>
    %52 = vector.shape_cast %51 : vector<16xf32> to vector<16x1xf32>
    %53 = vector.broadcast %52 : vector<16x1xf32> to vector<16x16xf32>
    %54 = arith.subf %50, %53 : vector<16x16xf32>
    %55 = math.exp %54 : vector<16x16xf32>
    %cst_28 = arith.constant dense<0.000000e+00> : vector<16xf32>
    %56 = vector.multi_reduction <add>, %55, %cst_28 [1] : vector<16x16xf32> to vector<16xf32>
    %57 = vector.shape_cast %56 : vector<16xf32> to vector<16x1xf32>
    %58 = vector.broadcast %57 : vector<16x1xf32> to vector<16x16xf32>
    %59 = arith.divf %55, %58 : vector<16x16xf32>
    %cst_29 = arith.constant dense<0.000000e+00> : vector<16x32xf32>
    %60 = tpu.matmul %59, %45, %cst_29 {dimension_numbers = #tpu.dot_dimension_numbers<[1], [0], [0], [1], [0, 0, 1, 1], [], []>} : vector<16x16xf32>, vector<16x32xf32>, vector<16x32xf32> -> vector<16x32xf32>
    %c0_30 = arith.constant 0 : index
    %c0_31 = arith.constant 0 : index
    %61 = vector.load %arg6[%c0_30, %c0_31] : memref<128x128xf32, #tpu.memory_space<vmem>>, vector<32x128xf32>
    %cst_32 = arith.constant dense<0.000000e+00> : vector<16x128xf32>
    %62 = tpu.matmul %60, %61, %cst_32 {dimension_numbers = #tpu.dot_dimension_numbers<[1], [0], [0], [1], [0, 0, 1, 1], [], []>} : vector<16x32xf32>, vector<32x128xf32>, vector<16x128xf32> -> vector<16x128xf32>
    %63 = arith.addf %42, %62 : vector<16x128xf32>
    %64 = vector.extract_strided_slice %28 {offsets = [0, 32], sizes = [16, 32], strides = [1, 1]} : vector<16x128xf32> to vector<16x32xf32>
    %65 = vector.extract_strided_slice %33 {offsets = [0, 32], sizes = [16, 32], strides = [1, 1]} : vector<16x128xf32> to vector<16x32xf32>
    %66 = vector.extract_strided_slice %38 {offsets = [0, 32], sizes = [16, 32], strides = [1, 1]} : vector<16x128xf32> to vector<16x32xf32>
    %cst_33 = arith.constant dense<0.000000e+00> : vector<16x16xf32>
    %67 = tpu.matmul %64, %65, %cst_33 {dimension_numbers = #tpu.dot_dimension_numbers<[1], [1], [0], [0], [0, 0, 1, 0], [], []>} : vector<16x32xf32>, vector<16x32xf32>, vector<16x16xf32> -> vector<16x16xf32>
    %cst_34 = arith.constant 0.176776692 : f32
    %68 = vector.broadcast %cst_34 : f32 to vector<16x16xf32>
    %69 = arith.mulf %67, %68 : vector<16x16xf32>
    %cst_35 = arith.constant -1.000000e+30 : f32
    %70 = vector.broadcast %cst_35 : f32 to vector<16x16xf32>
    %71 = arith.select %41, %69, %70 : vector<16x16xi1>, vector<16x16xf32>
    %cst_36 = arith.constant dense<0xFF800000> : vector<16xf32>
    %72 = vector.multi_reduction <maximumf>, %71, %cst_36 [1] : vector<16x16xf32> to vector<16xf32>
    %73 = vector.shape_cast %72 : vector<16xf32> to vector<16x1xf32>
    %74 = vector.broadcast %73 : vector<16x1xf32> to vector<16x16xf32>
    %75 = arith.subf %71, %74 : vector<16x16xf32>
    %76 = math.exp %75 : vector<16x16xf32>
    %cst_37 = arith.constant dense<0.000000e+00> : vector<16xf32>
    %77 = vector.multi_reduction <add>, %76, %cst_37 [1] : vector<16x16xf32> to vector<16xf32>
    %78 = vector.shape_cast %77 : vector<16xf32> to vector<16x1xf32>
    %79 = vector.broadcast %78 : vector<16x1xf32> to vector<16x16xf32>
    %80 = arith.divf %76, %79 : vector<16x16xf32>
    %cst_38 = arith.constant dense<0.000000e+00> : vector<16x32xf32>
    %81 = tpu.matmul %80, %66, %cst_38 {dimension_numbers = #tpu.dot_dimension_numbers<[1], [0], [0], [1], [0, 0, 1, 1], [], []>} : vector<16x16xf32>, vector<16x32xf32>, vector<16x32xf32> -> vector<16x32xf32>
    %c32 = arith.constant 32 : index
    %c0_39 = arith.constant 0 : index
    %82 = vector.load %arg6[%c32, %c0_39] : memref<128x128xf32, #tpu.memory_space<vmem>>, vector<32x128xf32>
    %cst_40 = arith.constant dense<0.000000e+00> : vector<16x128xf32>
    %83 = tpu.matmul %81, %82, %cst_40 {dimension_numbers = #tpu.dot_dimension_numbers<[1], [0], [0], [1], [0, 0, 1, 1], [], []>} : vector<16x32xf32>, vector<32x128xf32>, vector<16x128xf32> -> vector<16x128xf32>
    %84 = arith.addf %63, %83 : vector<16x128xf32>
    %85 = vector.extract_strided_slice %28 {offsets = [0, 64], sizes = [16, 32], strides = [1, 1]} : vector<16x128xf32> to vector<16x32xf32>
    %86 = vector.extract_strided_slice %33 {offsets = [0, 64], sizes = [16, 32], strides = [1, 1]} : vector<16x128xf32> to vector<16x32xf32>
    %87 = vector.extract_strided_slice %38 {offsets = [0, 64], sizes = [16, 32], strides = [1, 1]} : vector<16x128xf32> to vector<16x32xf32>
    %cst_41 = arith.constant dense<0.000000e+00> : vector<16x16xf32>
    %88 = tpu.matmul %85, %86, %cst_41 {dimension_numbers = #tpu.dot_dimension_numbers<[1], [1], [0], [0], [0, 0, 1, 0], [], []>} : vector<16x32xf32>, vector<16x32xf32>, vector<16x16xf32> -> vector<16x16xf32>
    %cst_42 = arith.constant 0.176776692 : f32
    %89 = vector.broadcast %cst_42 : f32 to vector<16x16xf32>
    %90 = arith.mulf %88, %89 : vector<16x16xf32>
    %cst_43 = arith.constant -1.000000e+30 : f32
    %91 = vector.broadcast %cst_43 : f32 to vector<16x16xf32>
    %92 = arith.select %41, %90, %91 : vector<16x16xi1>, vector<16x16xf32>
    %cst_44 = arith.constant dense<0xFF800000> : vector<16xf32>
    %93 = vector.multi_reduction <maximumf>, %92, %cst_44 [1] : vector<16x16xf32> to vector<16xf32>
    %94 = vector.shape_cast %93 : vector<16xf32> to vector<16x1xf32>
    %95 = vector.broadcast %94 : vector<16x1xf32> to vector<16x16xf32>
    %96 = arith.subf %92, %95 : vector<16x16xf32>
    %97 = math.exp %96 : vector<16x16xf32>
    %cst_45 = arith.constant dense<0.000000e+00> : vector<16xf32>
    %98 = vector.multi_reduction <add>, %97, %cst_45 [1] : vector<16x16xf32> to vector<16xf32>
    %99 = vector.shape_cast %98 : vector<16xf32> to vector<16x1xf32>
    %100 = vector.broadcast %99 : vector<16x1xf32> to vector<16x16xf32>
    %101 = arith.divf %97, %100 : vector<16x16xf32>
    %cst_46 = arith.constant dense<0.000000e+00> : vector<16x32xf32>
    %102 = tpu.matmul %101, %87, %cst_46 {dimension_numbers = #tpu.dot_dimension_numbers<[1], [0], [0], [1], [0, 0, 1, 1], [], []>} : vector<16x16xf32>, vector<16x32xf32>, vector<16x32xf32> -> vector<16x32xf32>
    %c64 = arith.constant 64 : index
    %c0_47 = arith.constant 0 : index
    %103 = vector.load %arg6[%c64, %c0_47] : memref<128x128xf32, #tpu.memory_space<vmem>>, vector<32x128xf32>
    %cst_48 = arith.constant dense<0.000000e+00> : vector<16x128xf32>
    %104 = tpu.matmul %102, %103, %cst_48 {dimension_numbers = #tpu.dot_dimension_numbers<[1], [0], [0], [1], [0, 0, 1, 1], [], []>} : vector<16x32xf32>, vector<32x128xf32>, vector<16x128xf32> -> vector<16x128xf32>
    %105 = arith.addf %84, %104 : vector<16x128xf32>
    %106 = vector.extract_strided_slice %28 {offsets = [0, 96], sizes = [16, 32], strides = [1, 1]} : vector<16x128xf32> to vector<16x32xf32>
    %107 = vector.extract_strided_slice %33 {offsets = [0, 96], sizes = [16, 32], strides = [1, 1]} : vector<16x128xf32> to vector<16x32xf32>
    %108 = vector.extract_strided_slice %38 {offsets = [0, 96], sizes = [16, 32], strides = [1, 1]} : vector<16x128xf32> to vector<16x32xf32>
    %cst_49 = arith.constant dense<0.000000e+00> : vector<16x16xf32>
    %109 = tpu.matmul %106, %107, %cst_49 {dimension_numbers = #tpu.dot_dimension_numbers<[1], [1], [0], [0], [0, 0, 1, 0], [], []>} : vector<16x32xf32>, vector<16x32xf32>, vector<16x16xf32> -> vector<16x16xf32>
    %cst_50 = arith.constant 0.176776692 : f32
    %110 = vector.broadcast %cst_50 : f32 to vector<16x16xf32>
    %111 = arith.mulf %109, %110 : vector<16x16xf32>
    %cst_51 = arith.constant -1.000000e+30 : f32
    %112 = vector.broadcast %cst_51 : f32 to vector<16x16xf32>
    %113 = arith.select %41, %111, %112 : vector<16x16xi1>, vector<16x16xf32>
    %cst_52 = arith.constant dense<0xFF800000> : vector<16xf32>
    %114 = vector.multi_reduction <maximumf>, %113, %cst_52 [1] : vector<16x16xf32> to vector<16xf32>
    %115 = vector.shape_cast %114 : vector<16xf32> to vector<16x1xf32>
    %116 = vector.broadcast %115 : vector<16x1xf32> to vector<16x16xf32>
    %117 = arith.subf %113, %116 : vector<16x16xf32>
    %118 = math.exp %117 : vector<16x16xf32>
    %cst_53 = arith.constant dense<0.000000e+00> : vector<16xf32>
    %119 = vector.multi_reduction <add>, %118, %cst_53 [1] : vector<16x16xf32> to vector<16xf32>
    %120 = vector.shape_cast %119 : vector<16xf32> to vector<16x1xf32>
    %121 = vector.broadcast %120 : vector<16x1xf32> to vector<16x16xf32>
    %122 = arith.divf %118, %121 : vector<16x16xf32>
    %cst_54 = arith.constant dense<0.000000e+00> : vector<16x32xf32>
    %123 = tpu.matmul %122, %108, %cst_54 {dimension_numbers = #tpu.dot_dimension_numbers<[1], [0], [0], [1], [0, 0, 1, 1], [], []>} : vector<16x16xf32>, vector<16x32xf32>, vector<16x32xf32> -> vector<16x32xf32>
    %c96 = arith.constant 96 : index
    %c0_55 = arith.constant 0 : index
    %124 = vector.load %arg6[%c96, %c0_55] : memref<128x128xf32, #tpu.memory_space<vmem>>, vector<32x128xf32>
    %cst_56 = arith.constant dense<0.000000e+00> : vector<16x128xf32>
    %125 = tpu.matmul %123, %124, %cst_56 {dimension_numbers = #tpu.dot_dimension_numbers<[1], [0], [0], [1], [0, 0, 1, 1], [], []>} : vector<16x32xf32>, vector<32x128xf32>, vector<16x128xf32> -> vector<16x128xf32>
    %126 = arith.addf %105, %125 : vector<16x128xf32>
    %c0_57 = arith.constant 0 : index
    %c0_58 = arith.constant 0 : index
    %127 = vector.load %arg7[%c0_57, %c0_58] : memref<1x128xf32, #tpu.memory_space<vmem>>, vector<1x128xf32>
    %128 = vector.broadcast %127 : vector<1x128xf32> to vector<16x128xf32>
    %129 = arith.addf %126, %128 : vector<16x128xf32>
    %130 = arith.addf %1, %129 : vector<16x128xf32>
    %cst_59 = arith.constant dense<0.000000e+00> : vector<16xf32>
    %131 = vector.multi_reduction <add>, %130, %cst_59 [1] : vector<16x128xf32> to vector<16xf32>
    %132 = vector.shape_cast %131 : vector<16xf32> to vector<16x1xf32>
    %cst_60 = arith.constant 1.280000e+02 : f32
    %133 = vector.broadcast %cst_60 : f32 to vector<16x1xf32>
    %134 = arith.divf %132, %133 : vector<16x1xf32>
    %135 = vector.broadcast %134 : vector<16x1xf32> to vector<16x128xf32>
    %136 = arith.subf %130, %135 : vector<16x128xf32>
    %137 = arith.mulf %136, %136 : vector<16x128xf32>
    %cst_61 = arith.constant dense<0.000000e+00> : vector<16xf32>
    %138 = vector.multi_reduction <add>, %137, %cst_61 [1] : vector<16x128xf32> to vector<16xf32>
    %139 = vector.shape_cast %138 : vector<16xf32> to vector<16x1xf32>
    %cst_62 = arith.constant 1.280000e+02 : f32
    %140 = vector.broadcast %cst_62 : f32 to vector<16x1xf32>
    %141 = arith.divf %139, %140 : vector<16x1xf32>
    %cst_63 = arith.constant 9.99999974E-6 : f32
    %142 = vector.broadcast %cst_63 : f32 to vector<16x1xf32>
    %143 = arith.addf %141, %142 : vector<16x1xf32>
    %144 = math.rsqrt %143 : vector<16x1xf32>
    %145 = vector.broadcast %144 : vector<16x1xf32> to vector<16x128xf32>
    %146 = arith.mulf %136, %145 : vector<16x128xf32>
    %c0_64 = arith.constant 0 : index
    %c0_65 = arith.constant 0 : index
    %147 = vector.load %arg8[%c0_64, %c0_65] : memref<1x128xf32, #tpu.memory_space<vmem>>, vector<1x128xf32>
    %148 = vector.broadcast %147 : vector<1x128xf32> to vector<16x128xf32>
    %149 = arith.mulf %146, %148 : vector<16x128xf32>
    %c0_66 = arith.constant 0 : index
    %c0_67 = arith.constant 0 : index
    %150 = vector.load %arg9[%c0_66, %c0_67] : memref<1x128xf32, #tpu.memory_space<vmem>>, vector<1x128xf32>
    %151 = vector.broadcast %150 : vector<1x128xf32> to vector<16x128xf32>
    %152 = arith.addf %149, %151 : vector<16x128xf32>
    %c0_68 = arith.constant 0 : index
    %c0_69 = arith.constant 0 : index
    %153 = vector.load %arg10[%c0_68, %c0_69] : memref<128x512xf32, #tpu.memory_space<vmem>>, vector<128x512xf32>
    %cst_70 = arith.constant dense<0.000000e+00> : vector<16x512xf32>
    %154 = tpu.matmul %152, %153, %cst_70 {dimension_numbers = #tpu.dot_dimension_numbers<[1], [0], [0], [1], [0, 0, 1, 1], [], []>} : vector<16x128xf32>, vector<128x512xf32>, vector<16x512xf32> -> vector<16x512xf32>
    %c0_71 = arith.constant 0 : index
    %c0_72 = arith.constant 0 : index
    %155 = vector.load %arg11[%c0_71, %c0_72] : memref<1x512xf32, #tpu.memory_space<vmem>>, vector<1x512xf32>
    %156 = vector.broadcast %155 : vector<1x512xf32> to vector<16x512xf32>
    %157 = arith.addf %154, %156 : vector<16x512xf32>
    %cst_73 = arith.constant -1.702000e+00 : f32
    %158 = vector.broadcast %cst_73 : f32 to vector<16x512xf32>
    %159 = arith.mulf %158, %157 : vector<16x512xf32>
    %160 = math.exp %159 : vector<16x512xf32>
    %cst_74 = arith.constant 1.000000e+00 : f32
    %161 = vector.broadcast %cst_74 : f32 to vector<16x512xf32>
    %162 = arith.addf %161, %160 : vector<16x512xf32>
    %cst_75 = arith.constant 1.000000e+00 : f32
    %163 = vector.broadcast %cst_75 : f32 to vector<16x512xf32>
    %164 = arith.divf %163, %162 : vector<16x512xf32>
    %165 = arith.mulf %157, %164 : vector<16x512xf32>
    %c0_76 = arith.constant 0 : index
    %c0_77 = arith.constant 0 : index
    %166 = vector.load %arg12[%c0_76, %c0_77] : memref<512x128xf32, #tpu.memory_space<vmem>>, vector<512x128xf32>
    %cst_78 = arith.constant dense<0.000000e+00> : vector<16x128xf32>
    %167 = tpu.matmul %165, %166, %cst_78 {dimension_numbers = #tpu.dot_dimension_numbers<[1], [0], [0], [1], [0, 0, 1, 1], [], []>} : vector<16x512xf32>, vector<512x128xf32>, vector<16x128xf32> -> vector<16x128xf32>
    %c0_79 = arith.constant 0 : index
    %c0_80 = arith.constant 0 : index
    %168 = vector.load %arg13[%c0_79, %c0_80] : memref<1x128xf32, #tpu.memory_space<vmem>>, vector<1x128xf32>
    %169 = vector.broadcast %168 : vector<1x128xf32> to vector<16x128xf32>
    %170 = arith.addf %167, %169 : vector<16x128xf32>
    %171 = arith.addf %130, %170 : vector<16x128xf32>
    %c0_81 = arith.constant 0 : index
    %c0_82 = arith.constant 0 : index
    %c0_83 = arith.constant 0 : index
    %172 = vector.load %arg14[%c0_81, %c0_82, %c0_83] : memref<1x16x128xf32, #tpu.memory_space<vmem>>, vector<1x16x128xf32>
    %173 = vector.shape_cast %172 : vector<1x16x128xf32> to vector<16x128xf32>
    %174 = vector.shape_cast %171 : vector<16x128xf32> to vector<1x16x128xf32>
    tpu.vector_store %arg14[%c0_81, %c0_82, %c0_83], %174 {strides = array<i32>} : memref<1x16x128xf32, #tpu.memory_space<vmem>>, vector<1x16x128xf32>,
    return
  }
  func.func @transform_0(%arg0: i32) -> (i32, i32, i32) {
    %c0_i32 = arith.constant 0 : i32
    %c0_i32_0 = arith.constant 0 : i32
    %c0_i32_1 = arith.constant 0 : i32
    return %arg0, %c0_i32, %c0_i32_0 : i32, i32, i32
  }
  func.func @transform_1(%arg0: i32) -> (i32, i32) {
    %c0_i32 = arith.constant 0 : i32
    %c0_i32_0 = arith.constant 0 : i32
    %c0_i32_1 = arith.constant 0 : i32
    return %c0_i32, %c0_i32_0 : i32, i32
  }
  func.func @transform_2(%arg0: i32) -> (i32, i32) {
    %c0_i32 = arith.constant 0 : i32
    %c0_i32_0 = arith.constant 0 : i32
    %c0_i32_1 = arith.constant 0 : i32
    return %c0_i32, %c0_i32_0 : i32, i32
  }
  func.func @transform_3(%arg0: i32) -> (i32, i32) {
    %c0_i32 = arith.constant 0 : i32
    %c0_i32_0 = arith.constant 0 : i32
    %c0_i32_1 = arith.constant 0 : i32
    return %c0_i32, %c0_i32_0 : i32, i32
  }
  func.func @transform_4(%arg0: i32) -> (i32, i32) {
    %c0_i32 = arith.constant 0 : i32
    %c0_i32_0 = arith.constant 0 : i32
    %c0_i32_1 = arith.constant 0 : i32
    return %c0_i32, %c0_i32_0 : i32, i32
  }
  func.func @transform_5(%arg0: i32) -> (i32, i32) {
    %c0_i32 = arith.constant 0 : i32
    %c0_i32_0 = arith.constant 0 : i32
    %c0_i32_1 = arith.constant 0 : i32
    return %c0_i32, %c0_i32_0 : i32, i32
  }
  func.func @transform_6(%arg0: i32) -> (i32, i32) {
    %c0_i32 = arith.constant 0 : i32
    %c0_i32_0 = arith.constant 0 : i32
    %c0_i32_1 = arith.constant 0 : i32
    return %c0_i32, %c0_i32_0 : i32, i32
  }
  func.func @transform_7(%arg0: i32) -> (i32, i32) {
    %c0_i32 = arith.constant 0 : i32
    %c0_i32_0 = arith.constant 0 : i32
    %c0_i32_1 = arith.constant 0 : i32
    return %c0_i32, %c0_i32_0 : i32, i32
  }
  func.func @transform_8(%arg0: i32) -> (i32, i32) {
    %c0_i32 = arith.constant 0 : i32
    %c0_i32_0 = arith.constant 0 : i32
    %c0_i32_1 = arith.constant 0 : i32
    return %c0_i32, %c0_i32_0 : i32, i32
  }
  func.func @transform_9(%arg0: i32) -> (i32, i32) {
    %c0_i32 = arith.constant 0 : i32
    %c0_i32_0 = arith.constant 0 : i32
    %c0_i32_1 = arith.constant 0 : i32
    return %c0_i32, %c0_i32_0 : i32, i32
  }
  func.func @transform_10(%arg0: i32) -> (i32, i32) {
    %c0_i32 = arith.constant 0 : i32
    %c0_i32_0 = arith.constant 0 : i32
    %c0_i32_1 = arith.constant 0 : i32
    return %c0_i32, %c0_i32_0 : i32, i32
  }
  func.func @transform_11(%arg0: i32) -> (i32, i32) {
    %c0_i32 = arith.constant 0 : i32
    %c0_i32_0 = arith.constant 0 : i32
    %c0_i32_1 = arith.constant 0 : i32
    return %c0_i32, %c0_i32_0 : i32, i32
  }
  func.func @transform_12(%arg0: i32) -> (i32, i32) {
    %c0_i32 = arith.constant 0 : i32
    %c0_i32_0 = arith.constant 0 : i32
    %c0_i32_1 = arith.constant 0 : i32
    return %c0_i32, %c0_i32_0 : i32, i32
  }
  func.func @transform_13(%arg0: i32) -> (i32, i32, i32) {
    %c0_i32 = arith.constant 0 : i32
    %c0_i32_0 = arith.constant 0 : i32
    %c0_i32_1 = arith.constant 0 : i32
    return %arg0, %c0_i32, %c0_i32_0 : i32, i32, i32
  }
}

</mosaic_0001>

<bundles_post_ra>
// kernel: tpu_custom_call.1
= control target key start
LH: loop header
LB: loop body
LE: loop exit
PB: predicated region body
PF: predicated region fallthrough
CT: control target
= control target key end

     0   :  { %s4261_s0 = inlined_call_operand.hbm [shape: f32[2,16,128], index: 0, kind: input, shape index: {}]   ;;  %s4262_s1 = inlined_call_operand.hbm [shape: f32[1,128], index: 1, kind: input, shape index: {}]   ;;  %s4263_s2 = inlined_call_operand.hbm [shape: f32[1,128], index: 2, kind: input, shape index: {}]   ;;  %s4264_s3 = inlined_call_operand.hbm [shape: f32[128,384], index: 3, kind: input, shape index: {}]   ;;  %s4265_s4 = inlined_call_operand.vmem [shape: f32[1,384], index: 4, kind: input, shape index: {}]   ;;  %s4266_s5 = inlined_call_operand.hbm [shape: f32[128,128], index: 5, kind: input, shape index: {}]   ;;  %s4267_s6 = inlined_call_operand.vmem [shape: f32[1,128], index: 6, kind: input, shape index: {}]   ;;  %s4268_s7 = inlined_call_operand.vmem [shape: f32[1,128], index: 7, kind: input, shape index: {}]   ;;  %s4269_s8 = inlined_call_operand.vmem [shape: f32[1,128], index: 8, kind: input, shape index: {}]   ;;  %s4270_s9 = inlined_call_operand.hbm [shape: f32[128,512], index: 9, kind: input, shape index: {}]   ;;  %s4271_s10 = inlined_call_operand.vmem [shape: f32[1,512], index: 10, kind: input, shape index: {}]   ;;  %s4272_s11 = inlined_call_operand.hbm [shape: f32[512,128], index: 11, kind: input, shape index: {}]   ;;  %s4273_s12 = inlined_call_operand.vmem [shape: f32[1,128], index: 12, kind: input, shape index: {}]   ;;  %s4274_s13 = inlined_call_operand.hbm [shape: f32[2,16,128], index: 13, kind: output, shape index: {}]  }
   0x1   :  { %4281 = sst [smem:[#allocation21_spill]] %s4262_s1 }
   0x2   :  { %4282 = sst [smem:[#allocation22_spill]] %s4263_s2 }
   0x3   :  { %4283 = sst [smem:[#allocation23_spill]] %s4264_s3 }
   0x4   :  { %4284 = sst [smem:[#allocation24_spill]] %s4266_s5 }
   0x5   :  { %4285 = sst [smem:[#allocation25_spill]] %s4270_s9 }
   0x6   :  { %4286 = sst [smem:[#allocation26_spill]] %s4272_s11 }
   0x7   :  { %18 = vsyncpa [#allocation3], 0 }
   0x8   :  { %20 = vsyncpa [#allocation3 + $0x1], 0 }
   0x9   :  { %21 = vsyncpa [#allocation6], 0 }
   0xa   :  { %22 = vsyncpa [#allocation9], 0 }
   0xb   :  { %23 = vsyncpa [#allocation12], 0 }
   0xc   :  { %24 = vsyncpa [#allocation4], 0 }
   0xd   :  { %26 = vsyncpa [#allocation4 + $0x1], 0  ;;  %s3759_s25 = smov 0   ;;  %s3761_s26 = smov 0  }
   0xe   :  { %s3763_s27 = smov 0   ;;  %s3765_s28 = smov 0  }
   0xf LB: > { %s3669_s29 = smov [#allocation5]   ;;  %s3780_s14 = sadd.s32 4294967295, %s3667_s28   ;;  %s3667_s28 = sphi %s3765_s28, %s4320_s28   ;;  %s3663_s27 = sphi %s3763_s27, %s4319_s27   ;;  %s3659_s26 = sphi %s3761_s26, %s4318_s26   ;;  %s3655_s25 = sphi %s3759_s25, %s4317_s25  }
  0x10   : > { %s354_s30 = sshll.u32 %s3669_s29, 4  ;;  %p2757_p0 = scmp.ge.s32.totalorder %s3667_s28, 1  ;;  %s355_s30 = int_to_ptr.vmem [resolvable:$true] %s354_s30 }
  0x11   : > { %p4275_p1 = scmp.eq.s32.totalorder %s3780_s14, 0  ;;  %p341_p2 = scmp.lt.s32.totalorder %s3667_s28, 3 }
  0x12   : > { %s3670_s16 = smov [#allocation8]   ;;  %s3671_s19 = smov [#allocation11]  }
  0x13   : > { %p3785_p3 = pnand %p2757_p0, %p341_p2  ;;  %s375_s17 = sshll.u32 %s3670_s16, 4  ;;  %s3792_s17 = int_to_ptr.vmem [resolvable:$true] %s375_s17 }
  0x14   : > { %s413_s20 = sshll.u32 %s3671_s19, 4  ;;  %s3418_s22 = scalar_lea.vmem %s355_s30, 16  ;;  %s3800_s20 = int_to_ptr.vmem [resolvable:$true] %s413_s20 }
  0x15   : > { %s4287_s15 = scalar_select %p3785_p3, 1, 0 }
  0x16   : > { %p3244_p5 = pneg %p3785_p3  ;;  %p3419_p8 = scmp.ne.s32.totalorder %s355_s30, %s3418_s22 }
  0x17   : > { %s3425_s23 = scalar_lea.vmem %s355_s30, 32  ;;  %p3426_p11 = scmp.lt.s32.totalorder %s355_s30, %s355_s30 }
  0x18   : > { %p3796_p6 = pnand %p3244_p5, %p4275_p1  ;;  %p3427_p12 = scmp.lt.s32.totalorder %s3425_s23, %s3418_s22 }
  0x1a   : > { %p3804_p7 = pneg %p3796_p6  ;;  %p3428_p13 = por %p3427_p12, %p3426_p11 }
  0x1c   : > { %p3421_p9 = pnand %p3419_p8, %p3804_p7 }
  0x1e   : > { %p3422_p10 = pneg %p3421_p9 }
  0x20   : > { %p3429_p0 = pnand %p3428_p13, %p3422_p10 }
  0x22   : > { %3432 = shalt.err (!%p3429_p0)
}
  0x23   : > { %s4290_s1 = sld [smem:[#allocation21_spill]]  ;;  %s3444_s16 = scalar_lea.vmem %s3792_s17, 6144 }
  0x24   : > { %p3445_p2 = scmp.ne.s32.totalorder %s3792_s17, %s3444_s16  ;;  %p3452_p9 = scmp.lt.s32.totalorder %s3792_s17, %s3792_s17 }
  0x25   : > { %p3453_p11 = scmp.lt.s32.totalorder %s3444_s16, %s3444_s16 }
  0x26   : > { %p3447_p5 = pnand %p3445_p2, %p3804_p7 }
  0x27   : > { %p3454_p10 = por %p3453_p11, %p3452_p9 }
  0x28   : > { %p3448_p8 = pneg %p3447_p5 }
  0x29   : > { %3247 = dma.hbm_to_vmem [thread:$0]  (!%p3796_p6), %s4290_s1, 16, %s355_s30, [#allocation6]  }
  0x2a   : > { %p3455_p12 = pnand %p3454_p10, %p3448_p8 }
  0x2c   : > { %3458 = shalt.err (!%p3455_p12)
}
  0x2d   : > { %s3672_s19 = smov 384   ;;  %s3673_s22 = smov 24  }
  0x2e   : > { %s4291_s3 = sld [smem:[#allocation23_spill]]  ;;  %s3470_s24 = scalar_lea.vmem %s3800_s20, 8192 }
  0x2f   : > { %p3471_p13 = scmp.ne.s32.totalorder %s3800_s20, %s3470_s24  ;;  %p3478_p5 = scmp.lt.s32.totalorder %s3800_s20, %s3800_s20 }
  0x30   : > { %p3479_p8 = scmp.lt.s32.totalorder %s3470_s24, %s3470_s24 }
  0x31   : > { %p3473_p0 = pnand %p3471_p13, %p3804_p7 }
  0x32   : > { %p3480_p9 = por %p3479_p8, %p3478_p5 }
  0x33   : > { %p3474_p2 = pneg %p3473_p0 }
  0x34   : > { %3253 = dma.hbm_to_vmem [thread:$0]  (!%p3796_p6), %s4291_s3, 6144, %s3792_s17, [#allocation9], %s3672_s19, %s3672_s19, %s3673_s22  }
  0x35   : > { %p3481_p11 = pnand %p3480_p9, %p3474_p2 }
  0x37   : > { %3484 = shalt.err (!%p3481_p11)
}
  0x38   : > { %s3674_s29 = smov 512   ;;  %s3675_s16 = smov 32  }
  0x39   : > { %s4292_s9 = sld [smem:[#allocation25_spill]]  ;;  %s3676_s17 = smov [#allocation7]  }
  0x3a   : > { %s365_s19 = sshll.u32 %s3676_s17, 4  ;;  %s3677_s22 = smov [#allocation10]   ;;  %s366_s19 = int_to_ptr.vmem [resolvable:$true] %s365_s19 }
  0x3b   : > { %s391_s23 = sshll.u32 %s3677_s22, 4  ;;  %s3496_s3 = scalar_lea.vmem %s366_s19, 16  ;;  %s392_s23 = int_to_ptr.vmem [resolvable:$true] %s391_s23 }
  0x3c   : > { %p3497_p10 = scmp.ne.s32.totalorder %s366_s19, %s3496_s3  ;;  %s3503_s24 = scalar_lea.vmem %s366_s19, 32 }
  0x3d   : > { %p3504_p0 = scmp.lt.s32.totalorder %s366_s19, %s366_s19  ;;  %p3505_p2 = scmp.lt.s32.totalorder %s3503_s24, %s3496_s3 }
  0x3e   : > { %p3499_p12 = pnand %p3497_p10, %p3804_p7 }
  0x3f   : > { %3259 = dma.hbm_to_vmem [thread:$0]  (!%p3796_p6), %s4292_s9, 8192, %s3800_s20, [#allocation12], %s3674_s29, %s3674_s29, %s3675_s16  }
  0x40   : > { %p3500_p13 = pneg %p3499_p12  ;;  %p3506_p5 = por %p3505_p2, %p3504_p0 }
  0x42   : > { %p3507_p8 = pnand %p3506_p5, %p3500_p13 }
  0x44   : > { %3510 = shalt.err (!%p3507_p8)
}
  0x45   : > { %s4293_s2 = sld [smem:[#allocation22_spill]]  ;;  %s3522_s29 = scalar_lea.vmem %s392_s23, 2048 }
  0x46   : > { %p3523_p9 = scmp.ne.s32.totalorder %s392_s23, %s3522_s29  ;;  %p3530_p12 = scmp.lt.s32.totalorder %s392_s23, %s392_s23 }
  0x47   : > { %p3531_p4 = scmp.lt.s32.totalorder %s3522_s29, %s3522_s29 }
  0x48   : > { %p3525_p11 = pnand %p3523_p9, %p3804_p7 }
  0x49   : > { %p3532_p1 = por %p3531_p4, %p3530_p12 }
  0x4a   : > { %p3526_p10 = pneg %p3525_p11 }
  0x4b   : > { %3250 = dma.hbm_to_vmem [thread:$0]  (!%p3796_p6), %s4293_s2, 16, %s366_s19, [#allocation6]  }
  0x4c   : > { %p3533_p3 = pnand %p3532_p1, %p3526_p10 }
  0x4e   : > { %3536 = shalt.err (!%p3533_p3)
}
  0x4f   : > { %s4277_s3 = smov 128   ;;  %s4278_s16 = smov 8  }
  0x50   : > { %s4294_s5 = sld [smem:[#allocation24_spill]]  ;;  %s3680_s19 = smov [#allocation13]  }
  0x51   : > { %s429_s22 = sshll.u32 %s3680_s19, 4  ;;  %s430_s22 = int_to_ptr.vmem [resolvable:$true] %s429_s22 }
  0x52   : > { %s3548_s24 = scalar_lea.vmem %s430_s22, 8192  ;;  %p3556_p4 = scmp.lt.s32.totalorder %s430_s22, %s430_s22 }
  0x53   : > { %p3549_p13 = scmp.ne.s32.totalorder %s430_s22, %s3548_s24  ;;  %p3557_p0 = scmp.lt.s32.totalorder %s3548_s24, %s3548_s24 }
  0x55   : > { %p3551_p1 = pnand %p3549_p13, %p3804_p7  ;;  %p3558_p2 = por %p3557_p0, %p3556_p4 }
  0x56   : > { %3256 = dma.hbm_to_vmem [thread:$0]  (!%p3796_p6), %s4294_s5, 2048, %s392_s23, [#allocation9], %s4277_s3, %s4277_s3, %s4278_s16  }
  0x57   : > { %p3552_p3 = pneg %p3551_p1 }
  0x59   : > { %p3559_p5 = pnand %p3558_p2, %p3552_p3 }
  0x5b   : > { %3562 = shalt.err (!%p3559_p5)
}
  0x5c   : > { %s4295_s11 = sld [smem:[#allocation26_spill]]  ;;  %s2756_s18 = sadd.s32 4294967294, %s3667_s28  }
  0x5d   : > { %s3868_s21 = sadd.s32 1, %s3667_s28   ;;  %s39_s29 = sadd.s32 1, %s3663_s27 }
  0x5e   : > { %s36_s20 = ssub.s32 %s3667_s28, %s3868_s21  ;;  %p46_p8 = scmp.ne.s32.totalorder %s3663_s27, %s3659_s26 }
  0x5f   : > { %p37_p7 = scmp.eq.s32.totalorder %s36_s20, 0  ;;  %p47_p9 = scmp.eq.s32.totalorder %s3667_s28, 0 }
  0x60   : > { %p52_p11 = scmp.ne.s32.totalorder %s3659_s26, %s3655_s25  ;;  %p4298_p12 = scmp.eq.s32.totalorder %s3780_s14, 0 }
  0x61   : > { %s3879_s30 = scalar_select %p37_p7, %s3663_s27, %s39_s29  }
  0x62   : > { %3262 = dma.hbm_to_vmem [thread:$0]  (!%p3796_p6), %s4295_s11, 8192, %s430_s22, [#allocation12], %s4277_s3, %s4277_s3, %s4278_s16  }
  0x63   : > { %4296 = sst [smem:[#allocation20_spill]] %s3879_s30  ;;  %p3881_p10 = por %p47_p9, %p46_p8 }
  0x64   : > { %p3887_p6 = por %p4298_p12, %p52_p11  ;;  %p328_p13 = scmp.eq.s32.totalorder %s3780_s14, 1 }
  0x65   : > { %p334_p1 = scmp.eq.s32.totalorder %s2756_s18, 1  ;;  %p3277_p3 = scmp.lt.s32.totalorder %s3667_s28, 2 }
  0x66   : > { %s4299_s19 = scalar_select %p3887_p6, 1, 0 }
  0x67   : > { %s446_s22 = sand.u32 1, %s3663_s27   ;;  %p3894_p4 = por %p328_p13, %p46_p8 }
  0x68   : > { %p3898_p0 = por %p334_p1, %p52_p11  ;;  %s2765_s23 = sshll.u32 %s446_s22, 4 }
  0x69   : > { %s4300_s24 = scalar_select %p3894_p4, 1, 0 }
  0x6a   : > { %s4301_s1 = scalar_select %p3898_p0, 1, 0 }
  0x6b   : > { %s2823_s20 = sshll.u32 %s3667_s28, 8  ;;  %s450_s18 = scalar_lea.vmem [#allocation2], %s2765_s23 }
  0x6c   : > { %s3906_s16 = scalar_lea.hbm %s4261_s0, %s2823_s20  ;;  %s457_s2 = sshll.u32 %s450_s18, 4  ;;  %s3908_s2 = int_to_ptr.vmem [resolvable:$true] %s457_s2 }
  0x6d   : > { %p3912_p2 = pnand %p3277_p3, %p3881_p10  ;;  %s3916_s9 = scalar_lea.sflag [#allocation3], %s446_s22 }
  0x6e   : > { %s3563_s11 = scalar_lea.hbm %s3906_s16, 256  ;;  %s3568_s23 = scalar_lea.hbm %s4261_s0, 512 }
  0x6f   : > { %p3564_p5 = scmp.ne.s32.totalorder %s3906_s16, %s3563_s11  ;;  %p3565_p7 = pneg %p3912_p2 }
  0x70   : > { %p3569_p11 = scmp.lt.s32.totalorder %s3906_s16, %s4261_s0  ;;  %p3570_p10 = scmp.lt.s32.totalorder %s3568_s23, %s3563_s11 }
  0x71   : > { %p3566_p8 = pnand %p3565_p7, %p3564_p5 }
  0x72   : > { %p3571_p12 = por %p3570_p10, %p3569_p11 }
  0x73   : > { %p3567_p9 = pneg %p3566_p8 }
  0x75   : > { %p3572_p13 = pnand %p3571_p12, %p3567_p9 }
  0x77   : > { %3575 = shalt.err (!%p3572_p13)
}
  0x78   : > { %s3576_s17 = scalar_lea.vmem %s3908_s2, 256  ;;  %s3681_s22 = smov [#allocation2]  }
  0x79   : > { %p3577_p1 = scmp.ne.s32.totalorder %s3908_s2, %s3576_s17  ;;  %s3581_s30 = sshll.u32 %s3681_s22, 4  ;;  %s3582_s30 = int_to_ptr.vmem [resolvable:$false] %s3581_s30 }
  0x7a   : > { %s3583_s3 = scalar_lea.vmem %s3582_s30, 512  ;;  %p3584_p8 = scmp.lt.s32.totalorder %s3908_s2, %s3582_s30 }
  0x7b   : > { %p3579_p3 = pnand %p3577_p1, %p3565_p7  ;;  %p3585_p0 = scmp.lt.s32.totalorder %s3583_s3, %s3576_s17 }
  0x7d   : > { %p3580_p5 = pneg %p3579_p3  ;;  %p3586_p4 = por %p3585_p0, %p3584_p8 }
  0x7f   : > { %p3587_p6 = pnand %p3586_p4, %p3580_p5 }
  0x81   : > { %3590 = shalt.err (!%p3587_p6)
}
  0x82   : > { %s4303_s11 = smov 8   ;;  %s4304_s20 = smov 128  }
  0x83   : > { %3266 = dma.hbm_to_vmem [thread:$0]  (!%p3912_p2), %s3906_s16, 256, %s3908_s2, %s3916_s9, %s4304_s20, %s4304_s20, %s4303_s11  }
  0x84   : > { %p4305_p7 = scmp.ne.s32.totalorder %s4287_s15, 0 }
  0x85   : > { %s3943_s23 = sand.u32 (!%p4305_p7), 1, %s3659_s26   ;;  %p4306_p6 = scmp.ne.s32.totalorder (!%p4305_p7), %s4299_s19, 0 }
  0x86   : > { %469 = sbr.rel (%p4305_p7) target bundleno = 3780 (0xec4), region = 72  ;;  %s2769_s30 = sshll.u32 (!%p4305_p7), %s3943_s23, 4 }
  0x87   : > { %s472_s29 = scalar_lea.sflag (!%p4305_p7), [#allocation3], %s3943_s23  ;;  %s475_s5 = scalar_lea.vmem (!%p4305_p7), [#allocation2], %s2769_s30 }
  0x8b   : > { %3634 = dma.done.wait (%p4306_p6), %s472_s29, 256  }
  0x8c   : > { %3636 = vsyncadd (%p4306_p6), %s472_s29, 4294967040  ;;  %p4307_p4 = scmp.eq.s32.totalorder %s3780_s14, 0 }
  0x8e   : > { %3638 = dma.done.wait (%p4307_p4), [#allocation6], 32   ;;  %p4308_p0 = pmov %p4307_p4 }
  0x90   : > { %3640 = vsyncadd (%p4308_p0), [#allocation6], 4294967264  ;;  %p4309_p2 = pmov %p4308_p0 }
  0x91   : > { %p4310_p9 = pmov %p4308_p0 }
  0x92   : > { %3642 = dma.done.wait (%p4309_p2), [#allocation9], 8192  }
  0x93   : > { %3644 = vsyncadd (%p4310_p9), [#allocation9], 4294959104  ;;  %p4311_p11 = pmov %p4308_p0 }
  0x94   : > { %p4312_p10 = pmov %p4308_p0 }
  0x95   : > { %3646 = dma.done.wait (%p4311_p11), [#allocation12], 16384  }
  0x96   : > { %3648 = vsyncadd (%p4312_p10), [#allocation12], 4294950912  ;;  %v3965_v0 = vld [vmem:[%s475_s5] sm:$0xff]  ;;  %v3968_v1 = vld [vmem:[%s475_s5 + $0x8] sm:$0xff]  ;;  %vm886_vm0 = vcmask 261120   ;;  %vm978_vm2 = vcmask 130048  }
  0x97   : > { %544 = vadd.xlane.f32.xlu0 %v3965_v0  ;;  %v600_v2 = vld [vmem:[#allocation8 + $0x168] sm:$0xff]  ;;  %v698_v3 = vld [vmem:[#allocation8 + $0x170] sm:$0xff]  ;;  %v697_v5 = vld [vmem:[#allocation8 + $0x158] sm:$0xff]  ;;  %s3682_s17 = smov 96   ;;  %s3683_s22 = smov 64  }
  0x98   : > { %v599_v4 = vld [vmem:[#allocation8 + $0x150] sm:$0xff]  ;;  %3011 = vmatprep.subr.mxu0 %v600_v2  ;;  %3046 = vmatprep.subr.mxu1 %v698_v3  ;;  %v598_v6 = vld [vmem:[#allocation8 + $0x138] sm:$0xff]  ;;  %v696_v15 = vld [vmem:[#allocation8 + $0x140] sm:$0xff]  ;;  %s3684_s3 = smov 32   ;;  %p4313_p13 = scmp.ne.s32.totalorder %s4300_s24, 0 }
  0x99   : > { %3012 = vmatpush3.msra.mxu0 %v600_v2  ;;  %3047 = vmatpush3.msra.mxu1 %v698_v3  ;;  %v597_v16 = vld [vmem:[#allocation8 + $0x120] sm:$0xff]  ;;  %v695_v17 = vld [vmem:[#allocation8 + $0x128] sm:$0xff]  ;;  %v694_v19 = vld [vmem:[#allocation8 + $0x110] sm:$0xff] }
  0x9a   : > { %3013 = vmatprep.subr.mxu0 %v599_v4  ;;  %3048 = vmatprep.subr.mxu1 %v697_v5  ;;  %v596_v18 = vld [vmem:[#allocation8 + $0x108] sm:$0xff]  ;;  %v595_v20 = vld [vmem:[#allocation8 + $0xf0] sm:$0xff]  ;;  %v693_v21 = vld [vmem:[#allocation8 + $0xf8] sm:$0xff] }
  0x9b   : > { %546 = vadd.xlane.f32.xlu0 %v3968_v1  ;;  %3014 = vmatpush3.msra.mxu0 %v599_v4  ;;  %v594_v22 = vld [vmem:[#allocation8 + $0xd8] sm:$0xff]  ;;  %v692_v23 = vld [vmem:[#allocation8 + $0xe0] sm:$0xff]  ;;  %v691_v25 = vld [vmem:[#allocation8 + $0xc8] sm:$0xff] }
  0x9c   : > { %3049 = vmatpush3.msra.mxu1 %v697_v5  ;;  %3015 = vmatprep.subr.mxu0 %v598_v6  ;;  %v593_v24 = vld [vmem:[#allocation8 + $0xc0] sm:$0xff]  ;;  %v592_v26 = vld [vmem:[#allocation8 + $0xa8] sm:$0xff]  ;;  %v690_v27 = vld [vmem:[#allocation8 + $0xb0] sm:$0xff] }
  0x9d   : > { %3016 = vmatpush3.msra.mxu0 %v598_v6  ;;  %3050 = vmatprep.subr.mxu1 %v696_v15  ;;  %v591_v28 = vld [vmem:[#allocation8 + $0x90] sm:$0xff]  ;;  %v689_v29 = vld [vmem:[#allocation8 + $0x98] sm:$0xff]  ;;  %v688_v31 = vld [vmem:[#allocation8 + $0x80] sm:$0xff] }
  0x9e   : > { %3017 = vmatprep.subr.mxu0 %v597_v16  ;;  %3051 = vmatpush3.msra.mxu1 %v696_v15  ;;  %v590_v30 = vld [vmem:[#allocation8 + $0x78] sm:$0xff]  ;;  %v589_v32 = vld [vmem:[#allocation8 + $0x60] sm:$0xff]  ;;  %v687_v33 = vld [vmem:[#allocation8 + $0x68] sm:$0xff] }
  0x9f   : > { %3018 = vmatpush3.msra.mxu0 %v597_v16  ;;  %3052 = vmatprep.subr.mxu1 %v695_v17  ;;  %v588_v34 = vld [vmem:[#allocation8 + $0x48] sm:$0xff]  ;;  %v686_v35 = vld [vmem:[#allocation8 + $0x50] sm:$0xff]  ;;  %v685_v37 = vld [vmem:[#allocation8 + $0x38] sm:$0xff] }
  0xa0   : > { %3019 = vmatprep.subr.mxu0 %v596_v18  ;;  %3053 = vmatpush3.msra.mxu1 %v695_v17  ;;  %v587_v36 = vld [vmem:[#allocation8 + $0x30] sm:$0xff]  ;;  %v586_v38 = vld [vmem:[#allocation8 + $0x18] sm:$0xff]  ;;  %v684_v39 = vld [vmem:[#allocation8 + $0x20] sm:$0xff] }
  0xa1   : > { %3020 = vmatpush3.msra.mxu0 %v596_v18  ;;  %3054 = vmatprep.subr.mxu1 %v694_v19  ;;  %v585_v40 = vld [vmem:[#allocation8] sm:$0xff]  ;;  %v683_v41 = vld [vmem:[#allocation8 + $0x8] sm:$0xff]  ;;  %v796_v42 = vld [vmem:[#allocation8 + $0x178] sm:$0xff] }
  0xa2   : > { %3021 = vmatprep.subr.mxu0 %v595_v20  ;;  %3055 = vmatpush3.msra.mxu1 %v694_v19  ;;  %v2777_v50 = vld [vmem:[#allocation5] ss:$0 sm:$0xff]  ;;  %v2778_v52 = vld [vmem:[#allocation7] ss:$0 sm:$0xff]  ;;  %v795_v59 = vld [vmem:[#allocation8 + $0x160] sm:$0xff] }
  0xa3   : > { %3022 = vmatpush3.msra.mxu0 %v595_v20  ;;  %3056 = vmatprep.subr.mxu1 %v693_v21  ;;  %v794_v60 = vld [vmem:[#allocation8 + $0x148] sm:$0xff]  ;;  %v793_v61 = vld [vmem:[#allocation8 + $0x130] sm:$0xff]  ;;  %v792_v62 = vld [vmem:[#allocation8 + $0x118] sm:$0xff] }
  0xa4   : > { %3023 = vmatprep.subr.mxu0 %v594_v22  ;;  %3057 = vmatpush3.msra.mxu1 %v693_v21  ;;  %v791_v63 = vld [vmem:[#allocation8 + $0x100] sm:$0xff]  ;;  %v790_v2 = vld [vmem:[#allocation8 + $0xe8] sm:$0xff]  ;;  %v789_v3 = vld [vmem:[#allocation8 + $0xd0] sm:$0xff] }
  0xa5   : > { %3024 = vmatpush3.msra.mxu0 %v594_v22  ;;  %3058 = vmatprep.subr.mxu1 %v692_v23  ;;  %v788_v4 = vld [vmem:[#allocation8 + $0xb8] sm:$0xff]  ;;  %v787_v5 = vld [vmem:[#allocation8 + $0xa0] sm:$0xff]  ;;  %v786_v6 = vld [vmem:[#allocation8 + $0x88] sm:$0xff] }
  0xa6   : > { %3025 = vmatprep.subr.mxu0 %v593_v24  ;;  %3059 = vmatpush3.msra.mxu1 %v692_v23  ;;  %v2779_v16 = vld [vmem:[%s4265_s4] ss:$0 sm:$0xff]  ;;  %v2781_v22 = vld [vmem:[%s4265_s4 + $0x2] ss:$0 sm:$0xff] }
  0xa7   : > { %3026 = vmatpush3.msra.mxu0 %v593_v24  ;;  %3060 = vmatprep.subr.mxu1 %v691_v25 }
  0xa8   : > { %3027 = vmatprep.subr.mxu0 %v592_v26  ;;  %3061 = vmatpush3.msra.mxu1 %v691_v25 }
  0xa9   : > { %3028 = vmatpush3.msra.mxu0 %v592_v26  ;;  %3062 = vmatprep.subr.mxu1 %v690_v27 }
  0xaa   : > { %3029 = vmatprep.subr.mxu0 %v591_v28  ;;  %3063 = vmatpush3.msra.mxu1 %v690_v27  ;;  %v879_v27 = vlaneseq }
  0xab   : > { %3030 = vmatpush3.msra.mxu0 %v591_v28  ;;  %3064 = vmatprep.subr.mxu1 %v689_v29 }
  0xac   : > { %3031 = vmatprep.subr.mxu0 %v590_v30  ;;  %3065 = vmatpush3.msra.mxu1 %v689_v29  ;;  %v4020_v28 = vshrl.u32 %v879_v27, 7 }
  0xad   : > { %3032 = vmatpush3.msra.mxu0 %v590_v30  ;;  %3066 = vmatprep.subr.mxu1 %v688_v31  ;;  %v4025_v30 = vand.u32 127, %v879_v27 }
  0xae   : > { %3033 = vmatprep.subr.mxu0 %v589_v32  ;;  %3067 = vmatpush3.msra.mxu1 %v688_v31  ;;  %v4023_v29 = vadd.s32 8, %v4020_v28 }
  0xaf   : > { %3034 = vmatpush3.msra.mxu0 %v589_v32  ;;  %3068 = vmatprep.subr.mxu1 %v687_v33  ;;  %vm884_vm3 = vcmp.le.s32.totalorder %v4025_v30, %v4020_v28 }
  0xb0   : > { %3035 = vmatprep.subr.mxu0 %v588_v34  ;;  %3069 = vmatpush3.msra.mxu1 %v687_v33  ;;  %vm885_vm1 = vcmp.le.s32.totalorder %v4025_v30, %v4023_v29 }
  0xb1   : > { %3036 = vmatpush3.msra.mxu0 %v588_v34  ;;  %3070 = vmatprep.subr.mxu1 %v686_v35 }
  0xb2   : > { %3037 = vmatprep.subr.mxu0 %v587_v36  ;;  %3071 = vmatpush3.msra.mxu1 %v686_v35 }
  0xb3   : > { %3038 = vmatpush3.msra.mxu0 %v587_v36  ;;  %3072 = vmatprep.subr.mxu1 %v685_v37 }
  0xb4   : > { %3039 = vmatprep.subr.mxu0 %v586_v38  ;;  %3073 = vmatpush3.msra.mxu1 %v685_v37 }
  0xb5   : > { %3040 = vmatpush3.msra.mxu0 %v586_v38  ;;  %3074 = vmatprep.subr.mxu1 %v684_v39 }
  0xb6   : > { %3041 = vmatprep.subr.mxu0 %v585_v40  ;;  %3075 = vmatpush3.msra.mxu1 %v684_v39 }
  0xb7   : > { %3042 = vmatpush3.msra.mxu0 %v585_v40  ;;  %3076 = vmatprep.subr.mxu1 %v683_v41 }
  0xb8   : > { %3077 = vmatpush3.msra.mxu1 %v683_v41  ;;  %3081 = vmatprep.subr.mxu0 %v796_v42 }
 0x120   : > { %v545_v7 = vpop.xlane.xlu0 %544 }
 0x121   : > { %v549_v8 = vmul.f32 0.0078125, %v545_v7  ;;  %v785_v7 = vld [vmem:[#allocation8 + $0x70] sm:$0xff] }
 0x123   : > { %v3972_v9 = vsub.f32 %v3965_v0, %v549_v8  ;;  %v784_v8 = vld [vmem:[#allocation8 + $0x58] sm:$0xff] }
 0x124   : > { %v547_v10 = vpop.xlane.xlu0 %546 }
 0x125   : > { %v550_v11 = vmul.f32 0.0078125, %v547_v10  ;;  %v553_v12 = vmul.f32 %v3972_v9, %v3972_v9  ;;  %v782_v10 = vld [vmem:[#allocation8 + $0x28] sm:$0xff] }
 0x127   : > { %v3977_v13 = vsub.f32 %v3968_v1, %v550_v11  ;;  %555 = vadd.xlane.f32.xlu1 %v553_v12  ;;  %v781_v11 = vld [vmem:[#allocation8 + $0x10] sm:$0xff]  ;;  %v2780_v12 = vld [vmem:[%s4265_s4 + $0x1] ss:$0 sm:$0xff] }
 0x129   : > { %v554_v14 = vmul.f32 %v3977_v13, %v3977_v13 }
 0x12b   : > { %557 = vadd.xlane.f32.xlu1 %v554_v14 }
 0x1b0   : > { %v556_v43 = vpop.xlane.xlu1 %555 }
 0x1b1   : > { %v559_v44 = vmul.f32 0.0078125, %v556_v43 }
 0x1b3   : > { %v561_v45 = vadd.f32 1e-05, %v559_v44 }
 0x1b4   : > { %v558_v46 = vpop.xlane.xlu1 %557 }
 0x1b5   : > { %3335 = vrsqrt.f32 %v561_v45  ;;  %v560_v47 = vmul.f32 0.0078125, %v558_v46 }
 0x1b7   : > { %v562_v48 = vadd.f32 1e-05, %v560_v47 }
 0x1b9   : > { %3337 = vrsqrt.f32 %v562_v48 }
 0x1c2   : > { %v3336_v49 = vpop.eup %3335 }
 0x1c3   : > { %v565_v51 = vmul.f32 %v3336_v49, %v3972_v9  ;;  %v783_v9 = vld [vmem:[#allocation8 + $0x40] sm:$0xff]  ;;  %v1085_v49 = vld [vmem:[#allocation10 + $0x18] sm:$0xff] }
 0x1c5   : > { %v574_v53 = vmul.f32 %v2777_v50, %v565_v51 }
 0x1c6   : > { %v3338_v54 = vpop.eup %3337 }
 0x1c7   : > { %v583_v55 = vadd.f32 %v2778_v52, %v574_v53  ;;  %v566_v56 = vmul.f32 %v3338_v54, %v3977_v13 }
 0x1c9   : > { %3043 = vmatprep.mubr.f32.mxu0 %v583_v55  ;;  %3078 = vmatprep.mubr.f32.mxu1 %v583_v55  ;;  %v575_v57 = vmul.f32 %v2777_v50, %v566_v56  ;;  %v1084_v50 = vld [vmem:[#allocation10 + $0x10] sm:$0xff] }
 0x1cb   : > { %v584_v58 = vadd.f32 %v2778_v52, %v575_v57 }
 0x1cd   : > { %3044 = vmatmul.mubr.f32.vlgmr.msra.gmra.mxu0 %v584_v58  ;;  %3079 = vmatmul.mubr.f32.vlgmr.msra.gmra.mxu1 %v584_v58 }
 0x1ce   : > { %3082 = vmatpush3.msra.mxu0 %v796_v42  ;;  %3113 = vmatprep.mubr.f32.mxu0 %v583_v55 }
 0x1cf   : > { %3083 = vmatprep.subr.mxu0 %v795_v59 }
 0x1d0   : > { %3084 = vmatpush3.msra.mxu0 %v795_v59 }
 0x1d1   : > { %3085 = vmatprep.subr.mxu0 %v794_v60 }
 0x1d2   : > { %3086 = vmatpush3.msra.mxu0 %v794_v60 }
 0x1d3   : > { %3087 = vmatprep.subr.mxu0 %v793_v61 }
 0x1d4   : > { %3088 = vmatpush3.msra.mxu0 %v793_v61  ;;  %v1083_v61 = vld [vmem:[#allocation10 + $0x8] sm:$0xff] }
 0x1d5   : > { %3089 = vmatprep.subr.mxu0 %v792_v62 }
 0x1d6   : > { %3090 = vmatpush3.msra.mxu0 %v792_v62  ;;  %v1082_v62 = vld [vmem:[#allocation10] sm:$0xff] }
 0x1d7   : > { %3091 = vmatprep.subr.mxu0 %v791_v63 }
 0x1d8   : > { %3092 = vmatpush3.msra.mxu0 %v791_v63 }
 0x1d9   : > { %3093 = vmatprep.subr.mxu0 %v790_v2 }
 0x1da   : > { %3094 = vmatpush3.msra.mxu0 %v790_v2 }
 0x1db   : > { %3095 = vmatprep.subr.mxu0 %v789_v3 }
 0x1dc   : > { %3096 = vmatpush3.msra.mxu0 %v789_v3 }
 0x1dd   : > { %3097 = vmatprep.subr.mxu0 %v788_v4 }
 0x1de   : > { %3098 = vmatpush3.msra.mxu0 %v788_v4 }
 0x1df   : > { %3099 = vmatprep.subr.mxu0 %v787_v5 }
 0x1e0   : > { %3100 = vmatpush3.msra.mxu0 %v787_v5 }
 0x1e1   : > { %3101 = vmatprep.subr.mxu0 %v786_v6 }
 0x1e2   : > { %3102 = vmatpush3.msra.mxu0 %v786_v6 }
 0x1e3   : > { %3103 = vmatprep.subr.mxu0 %v785_v7 }
 0x1e4   : > { %3104 = vmatpush3.msra.mxu0 %v785_v7 }
 0x1e5   : > { %3105 = vmatprep.subr.mxu0 %v784_v8 }
 0x1e6   : > { %3106 = vmatpush3.msra.mxu0 %v784_v8 }
 0x1e7   : > { %3107 = vmatprep.subr.mxu0 %v783_v9 }
 0x1e8   : > { %3108 = vmatpush3.msra.mxu0 %v783_v9 }
 0x1e9   : > { %3109 = vmatprep.subr.mxu0 %v782_v10 }
 0x1ea   : > { %3110 = vmatpush3.msra.mxu0 %v782_v10 }
 0x1eb   : > { %3111 = vmatprep.subr.mxu0 %v781_v11 }
 0x1ec   : > { %3112 = vmatpush3.msra.mxu0 %v781_v11 }
 0x1ed   : > { %3114 = vmatmul.mubr.f32.vlgmr.msra.gmra.mxu0 %v584_v58  ;;  %3155 = vmatprep.subr.mxu0 %v1085_v49 }
 0x1ee   : > { %3156 = vmatpush3.msra.mxu0 %v1085_v49 }
 0x1ef   : > { %3157 = vmatprep.subr.mxu0 %v1084_v50 }
 0x1f0   : > { %3158 = vmatpush3.msra.mxu0 %v1084_v50 }
 0x1f1   : > { %3159 = vmatprep.subr.mxu0 %v1083_v61 }
 0x1f2   : > { %3160 = vmatpush3.msra.mxu0 %v1083_v61 }
 0x1f3   : > { %3161 = vmatprep.subr.mxu0 %v1082_v62 }
 0x1f4   : > { %3162 = vmatpush3.msra.mxu0 %v1082_v62 }
 0x28d   : > { %v3045_v13 = vpop.f32.mrf.mxu0  ;;  %v3080_v14 = vpop.f32.mrf.mxu1 }
 0x28e   : > { %v3986_v15 = vadd.f32 %v3080_v14, %v2780_v12  ;;  %v4005_v21 = vadd.f32 %v3045_v13, %v2779_v16 }
 0x28f   : > { %v674_v17 = vpop.f32.mrf.mxu0  ;;  %v772_v18 = vpop.f32.mrf.mxu1 }
 0x290   : > { %v3991_v19 = vadd.f32 %v2779_v16, %v674_v17  ;;  %v3993_v20 = vadd.f32 %v2780_v12, %v772_v18  ;;  %3116 = vmatprep.subr.msk.mxu1 %vm886_vm0, %v3986_v15 }
 0x291   : > { %3117 = vmatpush3.xpose.msk.msra.mxu1 %vm886_vm0, %v3986_v15 }
 0x292   : > { %3118 = vmatprep.subr.msk.mxu1 %vm886_vm0, %v3993_v20  ;;  %3120 = vmatprep.mubr.msk.f32.mxu1 %vm886_vm0, %v3991_v19 }
 0x295   : > { %3119 = vmatpush3.xpose.msk.msra.mxu1 %vm886_vm0, %v3993_v20 }
 0x298   : > { %3121 = vmatmul.mubr.msk.f32.vlgmr.msra.gmra.mxu1 %vm886_vm0, %v4005_v21 }
 0x2ad   : > { %v3115_v23 = vpop.f32.mrf.mxu0 }
 0x2ae   : > { %v4012_v24 = vadd.f32 %v3115_v23, %v2781_v22 }
 0x2af   : > { %v870_v25 = vpop.f32.mrf.mxu0 }
 0x2b0   : > { %v4014_v26 = vadd.f32 %v2781_v22, %v870_v25  ;;  %3123 = vmatprep.subr.mxu1 %v4012_v24 }
 0x2b1   : > { %3124 = vmatpush3.msra.mxu1 %v4012_v24 }
 0x2b2   : > { %3125 = vmatprep.subr.mxu1 %v4014_v26 }
 0x2b3   : > { %3126 = vmatpush3.msra.mxu1 %v4014_v26 }
 0x358   : > { %v3122_v31 = vpop.f32.mrf.mxu1 }
 0x359   : > { %v975_v32 = vmul.f32 0.17677669, %v3122_v31 }
 0x35a   : > { %v965_v33 = vpop.f32.mrf.mxu1 }
 0x35b   : > { %v974_v34 = vmul.f32 0.17677669, %v965_v33  ;;  %v977_v35 = vsel %vm885_vm1, %v975_v32, -1e+30 }
 0x35c   : > { %v982_v36 = vsel %vm978_vm2, %v977_v35, -inf }
 0x35d   : > { %983 = vmax.xlane.f32.xlu1 %v982_v36  ;;  %v976_v37 = vsel %vm884_vm3, %v974_v34, -1e+30  ;;  %v1295_v34 = vld [vmem:[#allocation10 + $0x38] sm:$0xff] }
 0x35e   : > { %v979_v38 = vsel %vm978_vm2, %v976_v37, -inf }
 0x35f   : > { %980 = vmax.xlane.f32.xlu0 %v979_v38 }
 0x3e6   : > { %v984_v39 = vpop.xlane.xlu1 %983 }
 0x3e7   : > { %v986_v40 = vsub.f32 %v977_v35, %v984_v39 }
 0x3e8   : > { %v981_v41 = vpop.xlane.xlu0 %980 }
 0x3e9   : > { %v989_v42 = vmul.f32 1.442695, %v986_v40  ;;  %v985_v43 = vsub.f32 %v976_v37, %v981_v41 }
 0x3eb   : > { %3339 = vpow2.f32 %v989_v42  ;;  %v987_v44 = vmul.f32 1.442695, %v985_v43  ;;  %v1294_v42 = vld [vmem:[#allocation10 + $0x30] sm:$0xff]  ;;  %v1293_v43 = vld [vmem:[#allocation10 + $0x28] sm:$0xff] }
 0x3ed   : > { %3341 = vpow2.f32 %v987_v44 }
 0x3f8   : > { %v3340_v45 = vpop.eup %3339 }
 0x3f9   : > { %v994_v46 = vsel %vm978_vm2, %v3340_v45, 0.0 }
 0x3fa   : > { %v3342_v47 = vpop.eup %3341  ;;  %995 = vadd.xlane.f32.xlu1 %v994_v46 }
 0x3fb   : > { %v991_v48 = vsel %vm978_vm2, %v3342_v47, 0.0 }
 0x3fc   : > { %992 = vadd.xlane.f32.xlu0 %v991_v48 }
 0x40b   : > { %1090 = vrot.lane.b32.xlu1 %v3993_v20, %s3682_s17 }
 0x40f   : > { %1086 = vrot.lane.b32.xlu1 %v3991_v19, %s3682_s17 }
 0x412   : > { %1092 = vrot.lane.b32.xlu0 %v3986_v15, %s3682_s17 }
 0x413   : > { %1088 = vrot.lane.b32.xlu1 %v4005_v21, %s3682_s17 }
 0x483   : > { %v996_v51 = vpop.xlane.xlu1 %995 }
 0x484   : > { %3343 = vrcp.f32 %v996_v51 }
 0x485   : > { %v993_v52 = vpop.xlane.xlu0 %992 }
 0x486   : > { %3345 = vrcp.f32 %v993_v52 }
 0x487   : > { %v1091_v54 = vpop.permute.xlu1 %1090 }
 0x489   : > { %v1093_v53 = vpop.permute.xlu0 %1092 }
 0x48a   : > { %3130 = vmatprep.subr.msk.mxu1 %vm886_vm0, %v1093_v53 }
 0x48b   : > { %v1087_v59 = vpop.permute.xlu1 %1086 }
 0x48f   : > { %v1089_v60 = vpop.permute.xlu1 %1088 }
 0x491   : > { %v3344_v55 = vpop.eup %3343 }
 0x492   : > { %v1000_v58 = vmul.f32 %v3344_v55, %v3340_v45  ;;  %v1292_v45 = vld [vmem:[#allocation10 + $0x20] sm:$0xff] }
 0x493   : > { %v3346_v56 = vpop.eup %3345 }
 0x494   : > { %v998_v57 = vmul.f32 %v3346_v56, %v3342_v47 }
 0x496   : > { %3127 = vmatprep.mubr.msk.f32.mxu1 %vm978_vm2, %v998_v57 }
 0x497   : > { %3128 = vmatmul.mubr.msk.f32.vlgmr.msra.gmra.mxu1 %vm978_vm2, %v1000_v58 }
 0x498   : > { %3131 = vmatpush3.xpose.msk.msra.mxu1 %vm886_vm0, %v1093_v53  ;;  %3134 = vmatprep.mubr.msk.f32.mxu1 %vm886_vm0, %v1087_v59 }
 0x499   : > { %3132 = vmatprep.subr.msk.mxu1 %vm886_vm0, %v1091_v54 }
 0x49c   : > { %3133 = vmatpush3.xpose.msk.msra.mxu1 %vm886_vm0, %v1091_v54 }
 0x49f   : > { %3135 = vmatmul.mubr.msk.f32.vlgmr.msra.gmra.mxu1 %vm886_vm0, %v1089_v60 }
 0x557   : > { %v3129_v63 = vpop.f32.mrf.mxu1 }
 0x559   : > { %v1073_v2 = vpop.f32.mrf.mxu1 }
 0x55a   : > { %3163 = vmatprep.mubr.msk.f32.mxu0 %vm886_vm0, %v1073_v2 }
 0x55b   : > { %3164 = vmatmul.mubr.msk.f32.vlgmr.msra.gmra.mxu0 %vm886_vm0, %v3129_v63 }
 0x55f   : > { %v3136_v3 = vpop.f32.mrf.mxu1 }
 0x560   : > { %v1178_v4 = vmul.f32 0.17677669, %v3136_v3 }
 0x561   : > { %v1168_v5 = vpop.f32.mrf.mxu1 }
 0x562   : > { %v1177_v6 = vmul.f32 0.17677669, %v1168_v5  ;;  %v1180_v7 = vsel %vm885_vm1, %v1178_v4, -1e+30 }
 0x563   : > { %v1184_v8 = vsel %vm978_vm2, %v1180_v7, -inf }
 0x564   : > { %1185 = vmax.xlane.f32.xlu1 %v1184_v8  ;;  %v1179_v9 = vsel %vm884_vm3, %v1177_v6, -1e+30 }
 0x565   : > { %v1181_v10 = vsel %vm978_vm2, %v1179_v9, -inf }
 0x566   : > { %1182 = vmax.xlane.f32.xlu0 %v1181_v10 }
 0x575   : > { %1205 = vrot.lane.b32.xlu1 %v4014_v26, %s3682_s17 }
 0x579   : > { %1464 = vrot.lane.b32.xlu1 %v3986_v15, %s3683_s22 }
 0x57d   : > { %1462 = vrot.lane.b32.xlu1 %v3993_v20, %s3683_s22 }
 0x581   : > { %1460 = vrot.lane.b32.xlu1 %v4005_v21, %s3683_s22 }
 0x585   : > { %1753 = vrot.lane.b32.xlu1 %v3993_v20, %s3684_s3 }
 0x589   : > { %1751 = vrot.lane.b32.xlu1 %v4005_v21, %s3684_s3 }
 0x5ed   : > { %v1186_v11 = vpop.xlane.xlu1 %1185 }
 0x5ee   : > { %v1188_v12 = vsub.f32 %v1180_v7, %v1186_v11 }
 0x5ef   : > { %v1183_v13 = vpop.xlane.xlu0 %1182 }
 0x5f0   : > { %v1191_v14 = vmul.f32 1.442695, %v1188_v12  ;;  %v1187_v16 = vsub.f32 %v1179_v9, %v1183_v13 }
 0x5f1   : > { %v1206_v20 = vpop.permute.xlu1 %1205 }
 0x5f2   : > { %3347 = vpow2.f32 %v1191_v14  ;;  %v1189_v17 = vmul.f32 1.442695, %v1187_v16 }
 0x5f4   : > { %3349 = vpow2.f32 %v1189_v17 }
 0x5f5   : > { %v1465_v21 = vpop.permute.xlu1 %1464 }
 0x5f9   : > { %v1463_v32 = vpop.permute.xlu1 %1462 }
 0x5fd   : > { %v1461_v35 = vpop.permute.xlu1 %1460 }
 0x5ff   : > { %v3348_v18 = vpop.eup %3347 }
 0x600   : > { %v1196_v22 = vsel %vm978_vm2, %v3348_v18, 0.0 }
 0x601   : > { %v3350_v23 = vpop.eup %3349  ;;  %1197 = vadd.xlane.f32.xlu0 %v1196_v22  ;;  %v1754_v38 = vpop.permute.xlu1 %1753 }
 0x602   : > { %v1193_v25 = vsel %vm978_vm2, %v3350_v23, 0.0 }
 0x605   : > { %1194 = vadd.xlane.f32.xlu0 %v1193_v25  ;;  %v1752_v44 = vpop.permute.xlu1 %1751 }
 0x61b   : > { %1207 = vrot.lane.b32.xlu0 %v4012_v24, %s3682_s17  ;;  %v4119_v58 = vpop.f32.mrf.mxu0  ;;  %s541_s17 = scalar_lea.vmem [#allocation14], %s2769_s30  ;;  %s2613_s30 = scalar_lea.sflag [#allocation4], %s3943_s23 }
 0x61d   : > { %v4121_v59 = vpop.f32.mrf.mxu0 }
 0x61f   : > { %1458 = vrot.lane.b32.xlu0 %v3991_v19, %s3683_s22 }
 0x623   : > { %1755 = vrot.lane.b32.xlu0 %v3986_v15, %s3684_s3 }
 0x627   : > { %1749 = vrot.lane.b32.xlu0 %v3991_v19, %s3684_s3 }
 0x68a   : > { %v1198_v27 = vpop.xlane.xlu0 %1197 }
 0x68b   : > { %3351 = vrcp.f32 %v1198_v27 }
 0x68e   : > { %v1195_v31 = vpop.xlane.xlu0 %1194 }
 0x68f   : > { %3353 = vrcp.f32 %v1195_v31 }
 0x692   : > { %v1208_v33 = vpop.permute.xlu0 %1207 }
 0x693   : > { %3137 = vmatprep.subr.mxu1 %v1208_v33 }
 0x694   : > { %3138 = vmatpush3.msra.mxu1 %v1208_v33 }
 0x695   : > { %3139 = vmatprep.subr.mxu1 %v1206_v20 }
 0x696   : > { %3140 = vmatpush3.msra.mxu1 %v1206_v20  ;;  %v1459_v36 = vpop.permute.xlu0 %1458 }
 0x697   : > { %3144 = vmatprep.subr.mxu1 %v1295_v34 }
 0x698   : > { %v3352_v37 = vpop.eup %3351 }
 0x699   : > { %v1202_v41 = vmul.f32 %v3352_v37, %v3348_v18 }
 0x69a   : > { %v1756_v15 = vpop.permute.xlu0 %1755 }
 0x69b   : > { %3191 = vmatprep.subr.msk.mxu0 %vm886_vm0, %v1756_v15 }
 0x69c   : > { %v3354_v19 = vpop.eup %3353  ;;  %3192 = vmatpush3.xpose.msk.msra.mxu0 %vm886_vm0, %v1756_v15 }
 0x69d   : > { %3193 = vmatprep.subr.msk.mxu0 %vm886_vm0, %v1754_v38  ;;  %v1200_v39 = vmul.f32 %v3354_v19, %v3350_v23 }
 0x69e   : > { %v1750_v40 = vpop.permute.xlu0 %1749 }
 0x69f   : > { %3141 = vmatprep.mubr.msk.f32.mxu1 %vm978_vm2, %v1200_v39  ;;  %3195 = vmatprep.mubr.msk.f32.mxu0 %vm886_vm0, %v1750_v40 }
 0x6a0   : > { %3142 = vmatmul.mubr.msk.f32.vlgmr.msra.gmra.mxu1 %vm978_vm2, %v1202_v41  ;;  %3194 = vmatpush3.xpose.msk.msra.mxu0 %vm886_vm0, %v1754_v38 }
 0x6a1   : > { %3145 = vmatpush3.msra.mxu1 %v1295_v34 }
 0x6a2   : > { %3146 = vmatprep.subr.mxu1 %v1294_v42 }
 0x6a3   : > { %3147 = vmatpush3.msra.mxu1 %v1294_v42  ;;  %3196 = vmatmul.mubr.msk.f32.vlgmr.msra.gmra.mxu0 %vm886_vm0, %v1752_v44 }
 0x6a4   : > { %3148 = vmatprep.subr.mxu1 %v1293_v43 }
 0x6a5   : > { %3149 = vmatpush3.msra.mxu1 %v1293_v43 }
 0x6a6   : > { %3150 = vmatprep.subr.mxu1 %v1292_v45 }
 0x6a7   : > { %3151 = vmatpush3.msra.mxu1 %v1292_v45 }
 0x6a8   : > { %3166 = vmatprep.subr.msk.mxu1 %vm886_vm0, %v1465_v21 }
 0x760   : > { %v3143_v46 = vpop.f32.mrf.mxu1 }
 0x762   : > { %v1283_v47 = vpop.f32.mrf.mxu1 }
 0x763   : > { %3152 = vmatprep.mubr.msk.f32.mxu1 %vm886_vm0, %v1283_v47  ;;  %v3197_v60 = vpop.f32.mrf.mxu0 }
 0x764   : > { %3153 = vmatmul.mubr.msk.f32.vlgmr.msra.gmra.mxu1 %vm886_vm0, %v3143_v46  ;;  %v1841_v18 = vmul.f32 0.17677669, %v3197_v60 }
 0x765   : > { %3167 = vmatpush3.xpose.msk.msra.mxu1 %vm886_vm0, %v1465_v21  ;;  %3170 = vmatprep.mubr.msk.f32.mxu1 %vm886_vm0, %v1459_v36  ;;  %v1831_v61 = vpop.f32.mrf.mxu0  ;;  %v1662_v36 = vld [vmem:[#allocation10 + $0x40] sm:$0xff] }
 0x766   : > { %3168 = vmatprep.subr.msk.mxu1 %vm886_vm0, %v1463_v32  ;;  %v1840_v62 = vmul.f32 0.17677669, %v1831_v61  ;;  %v1843_v22 = vsel %vm885_vm1, %v1841_v18, -1e+30  ;;  %v2145_v18 = vld [vmem:[#allocation11 + $0x1b0] sm:$0xff] }
 0x767   : > { %v1847_v23 = vsel %vm978_vm2, %v1843_v22, -inf }
 0x768   : > { %v1842_v63 = vsel %vm884_vm3, %v1840_v62, -1e+30 }
 0x769   : > { %3169 = vmatpush3.xpose.msk.msra.mxu1 %vm886_vm0, %v1463_v32  ;;  %v1844_v2 = vsel %vm978_vm2, %v1842_v63, -inf  ;;  %v1665_v32 = vld [vmem:[#allocation10 + $0x58] sm:$0xff] }
 0x76c   : > { %3171 = vmatmul.mubr.msk.f32.vlgmr.msra.gmra.mxu1 %vm886_vm0, %v1461_v35  ;;  %v1664_v35 = vld [vmem:[#allocation10 + $0x50] sm:$0xff] }
 0x824   : > { %v4105_v48 = vpop.f32.mrf.mxu1 }
 0x826   : > { %v4107_v49 = vpop.f32.mrf.mxu1 }
 0x82c   : > { %v3172_v50 = vpop.f32.mrf.mxu1 }
 0x82d   : > { %v1550_v51 = vmul.f32 0.17677669, %v3172_v50 }
 0x82e   : > { %v1540_v52 = vpop.f32.mrf.mxu1 }
 0x82f   : > { %v1549_v53 = vmul.f32 0.17677669, %v1540_v52  ;;  %v1552_v54 = vsel %vm885_vm1, %v1550_v51, -1e+30  ;;  %v1955_v52 = vld [vmem:[#allocation10 + $0x70] sm:$0xff] }
 0x830   : > { %v1556_v55 = vsel %vm978_vm2, %v1552_v54, -inf }
 0x831   : > { %1557 = vmax.xlane.f32.xlu1 %v1556_v55  ;;  %v1551_v56 = vsel %vm884_vm3, %v1549_v53, -1e+30  ;;  %v1954_v53 = vld [vmem:[#allocation10 + $0x68] sm:$0xff]  ;;  %v1455_v55 = vadd.f32 %v4119_v58, %v4105_v48 }
 0x832   : > { %v1553_v57 = vsel %vm978_vm2, %v1551_v56, -inf }
 0x833   : > { %1554 = vmax.xlane.f32.xlu0 %v1553_v57  ;;  %v1450_v57 = vadd.f32 %v4121_v59, %v4107_v49 }
 0x842   : > { %1575 = vrot.lane.b32.xlu1 %v4014_v26, %s3683_s22 }
 0x866   : > { %1845 = vmax.xlane.f32.xlu1 %v1844_v2 }
 0x8ba   : > { %v1558_v3 = vpop.xlane.xlu1 %1557 }
 0x8bb   : > { %v1560_v4 = vsub.f32 %v1552_v54, %v1558_v3  ;;  %v1953_v54 = vld [vmem:[#allocation10 + $0x60] sm:$0xff] }
 0x8bc   : > { %v1555_v5 = vpop.xlane.xlu0 %1554 }
 0x8bd   : > { %v1563_v6 = vmul.f32 1.442695, %v1560_v4  ;;  %v1559_v7 = vsub.f32 %v1551_v56, %v1555_v5  ;;  %v2814_v4 = vld [vmem:[%s4267_s6] ss:$0 sm:$0xff] }
 0x8be   : > { %v1576_v13 = vpop.permute.xlu1 %1575 }
 0x8bf   : > { %3355 = vpow2.f32 %v1563_v6  ;;  %v1561_v8 = vmul.f32 1.442695, %v1559_v7 }
 0x8c1   : > { %3357 = vpow2.f32 %v1561_v8  ;;  %v2152_v8 = vld [vmem:[#allocation11 + $0x1e8] sm:$0xff] }
 0x8cc   : > { %v3356_v9 = vpop.eup %3355 }
 0x8cd   : > { %v1568_v10 = vsel %vm978_vm2, %v3356_v9, 0.0 }
 0x8ce   : > { %v3358_v11 = vpop.eup %3357  ;;  %1569 = vadd.xlane.f32.xlu0 %v1568_v10  ;;  %v2151_v10 = vld [vmem:[#allocation11 + $0x1e0] sm:$0xff] }
 0x8cf   : > { %v1565_v12 = vsel %vm978_vm2, %v3358_v11, 0.0 }
 0x8d2   : > { %1566 = vadd.xlane.f32.xlu0 %v1565_v12  ;;  %v2148_v12 = vld [vmem:[#allocation11 + $0x1c8] sm:$0xff] }
 0x8e8   : > { %1577 = vrot.lane.b32.xlu0 %v4012_v24, %s3683_s22  ;;  %s2626_s22 = sshll.u32 %s541_s17, 4  ;;  %s4212_s22 = int_to_ptr.vmem [resolvable:$true] %s2626_s22 }
 0x8e9   : > { %s3591_s5 = scalar_lea.vmem %s4212_s22, 256 }
 0x8ea   : > { %p3592_p12 = scmp.ne.s32.totalorder %s4212_s22, %s3591_s5 }
 0x8ec   : > { %p3593_p1 = pnand %p3592_p12, %p4313_p13 }
 0x8ee   : > { %p3594_p3 = pneg %p3593_p1 }
 0x8ef   : > { %v1846_v14 = vpop.xlane.xlu1 %1845 }
 0x8f0   : > { %v1850_v16 = vsub.f32 %v1842_v63, %v1846_v14  ;;  %v2147_v14 = vld [vmem:[#allocation11 + $0x1c0] sm:$0xff] }
 0x8f2   : > { %v1852_v17 = vmul.f32 1.442695, %v1850_v16  ;;  %v2144_v16 = vld [vmem:[#allocation11 + $0x1a8] sm:$0xff] }
 0x8f4   : > { %3359 = vpow2.f32 %v1852_v17  ;;  %v2146_v17 = vld [vmem:[#allocation11 + $0x1b8] sm:$0xff] }
 0x901   : > { %v3360_v25 = vpop.eup %3359 }
 0x902   : > { %v1856_v20 = vsel %vm978_vm2, %v3360_v25, 0.0 }
 0x907   : > { %1848 = vmax.xlane.f32.xlu0 %v1847_v23 }
 0x90b   : > { %1857 = vadd.xlane.f32.xlu0 %v1856_v20 }
 0x921   : > { %1868 = vrot.lane.b32.xlu0 %v4012_v24, %s3684_s3  ;;  %v1663_v24 = vld [vmem:[#allocation10 + $0x48] sm:$0xff] }
 0x957   : > { %v1570_v21 = vpop.xlane.xlu0 %1569 }
 0x958   : > { %3361 = vrcp.f32 %v1570_v21 }
 0x95b   : > { %v1567_v27 = vpop.xlane.xlu0 %1566 }
 0x95c   : > { %3363 = vrcp.f32 %v1567_v27 }
 0x95f   : > { %v1578_v31 = vpop.permute.xlu0 %1577 }
 0x960   : > { %3173 = vmatprep.subr.mxu1 %v1578_v31 }
 0x961   : > { %3174 = vmatpush3.msra.mxu1 %v1578_v31 }
 0x962   : > { %3175 = vmatprep.subr.mxu1 %v1576_v13 }
 0x963   : > { %3176 = vmatpush3.msra.mxu1 %v1576_v13  ;;  %v2150_v13 = vld [vmem:[#allocation11 + $0x1d8] sm:$0xff] }
 0x964   : > { %3180 = vmatprep.subr.mxu1 %v1665_v32 }
 0x965   : > { %v3362_v29 = vpop.eup %3361 }
 0x966   : > { %v1574_v34 = vmul.f32 %v3362_v29, %v3356_v9  ;;  %v2154_v9 = vld [vmem:[#allocation11 + $0x1f8] sm:$0xff]  ;;  %v2140_v29 = vld [vmem:[#allocation11 + $0x188] sm:$0xff] }
 0x969   : > { %v3364_v30 = vpop.eup %3363 }
 0x96a   : > { %v1572_v33 = vmul.f32 %v3364_v30, %v3358_v11  ;;  %v2153_v11 = vld [vmem:[#allocation11 + $0x1f0] sm:$0xff]  ;;  %v2142_v30 = vld [vmem:[#allocation11 + $0x198] sm:$0xff] }
 0x96c   : > { %3177 = vmatprep.mubr.msk.f32.mxu1 %vm978_vm2, %v1572_v33  ;;  %v2139_v33 = vld [vmem:[#allocation11 + $0x180] sm:$0xff] }
 0x96d   : > { %3178 = vmatmul.mubr.msk.f32.vlgmr.msra.gmra.mxu1 %vm978_vm2, %v1574_v34  ;;  %v2141_v34 = vld [vmem:[#allocation11 + $0x190] sm:$0xff] }
 0x96e   : > { %3181 = vmatpush3.msra.mxu1 %v1665_v32 }
 0x96f   : > { %3182 = vmatprep.subr.mxu1 %v1664_v35 }
 0x970   : > { %3183 = vmatpush3.msra.mxu1 %v1664_v35  ;;  %v2136_v35 = vld [vmem:[#allocation11 + $0x168] sm:$0xff] }
 0x971   : > { %3184 = vmatprep.subr.mxu1 %v1663_v24 }
 0x972   : > { %3185 = vmatpush3.msra.mxu1 %v1663_v24  ;;  %v2138_v24 = vld [vmem:[#allocation11 + $0x178] sm:$0xff] }
 0x973   : > { %3186 = vmatprep.subr.mxu1 %v1662_v36 }
 0x974   : > { %3187 = vmatpush3.msra.mxu1 %v1662_v36  ;;  %v2135_v36 = vld [vmem:[#allocation11 + $0x160] sm:$0xff] }
 0x990   : > { %v1849_v15 = vpop.xlane.xlu0 %1848 }
 0x991   : > { %v1851_v37 = vsub.f32 %v1843_v22, %v1849_v15  ;;  %v2137_v15 = vld [vmem:[#allocation11 + $0x170] sm:$0xff] }
 0x993   : > { %v1854_v19 = vmul.f32 1.442695, %v1851_v37  ;;  %v2132_v37 = vld [vmem:[#allocation11 + $0x148] sm:$0xff] }
 0x994   : > { %v1858_v38 = vpop.xlane.xlu0 %1857 }
 0x995   : > { %3365 = vpow2.f32 %v1854_v19  ;;  %v2134_v19 = vld [vmem:[#allocation11 + $0x158] sm:$0xff] }
 0x996   : > { %3367 = vrcp.f32 %v1858_v38  ;;  %v2131_v38 = vld [vmem:[#allocation11 + $0x140] sm:$0xff] }
 0x998   : > { %v1869_v39 = vpop.permute.xlu0 %1868 }
 0x999   : > { %3198 = vmatprep.subr.mxu1 %v1869_v39 }
 0x9a2   : > { %v3366_v40 = vpop.eup %3365 }
 0x9a3   : > { %v1859_v41 = vsel %vm978_vm2, %v3366_v40, 0.0  ;;  %v3368_v42 = vpop.eup %3367 }
 0x9a4   : > { %1860 = vadd.xlane.f32.xlu1 %v1859_v41  ;;  %v1863_v46 = vmul.f32 %v3368_v42, %v3360_v25  ;;  %v2130_v41 = vld [vmem:[#allocation11 + $0x138] sm:$0xff]  ;;  %v2127_v42 = vld [vmem:[#allocation11 + $0x120] sm:$0xff] }
 0x9b5   : > { %1866 = vrot.lane.b32.xlu1 %v4014_v26, %s3684_s3  ;;  %v1956_v26 = vld [vmem:[#allocation10 + $0x78] sm:$0xff]  ;;  %s2824_s3 = sshll.u32 %s3780_s14, 8  ;;  %s3686_s14 = smov [#allocation14]  }
 0x9b6   : > { %3205 = vmatprep.subr.mxu0 %v1956_v26  ;;  %s4217_s29 = scalar_lea.hbm %s4274_s13, %s2824_s3  ;;  %s3595_s2 = sshll.u32 %s3686_s14, 4  ;;  %s3596_s2 = int_to_ptr.vmem [resolvable:$false] %s3595_s2 }
 0x9b7   : > { %3206 = vmatpush3.msra.mxu0 %v1956_v26  ;;  %v2119_v26 = vld [vmem:[#allocation11 + $0xe0] sm:$0xff]  ;;  %s3597_s9 = scalar_lea.vmem %s3596_s2, 512  ;;  %p3598_p5 = scmp.lt.s32.totalorder %s4212_s22, %s3596_s2 }
 0x9b8   : > { %3207 = vmatprep.subr.mxu0 %v1955_v52  ;;  %p3599_p8 = scmp.lt.s32.totalorder %s3597_s9, %s3591_s5 }
 0x9b9   : > { %3208 = vmatpush3.msra.mxu0 %v1955_v52  ;;  %v2121_v52 = vld [vmem:[#allocation11 + $0xf0] sm:$0xff] }
 0x9ba   : > { %3209 = vmatprep.subr.mxu0 %v1954_v53  ;;  %p3600_p7 = por %p3599_p8, %p3598_p5 }
 0x9bb   : > { %3210 = vmatpush3.msra.mxu0 %v1954_v53  ;;  %v2116_v53 = vld [vmem:[#allocation11 + $0xc8] sm:$0xff] }
 0x9bc   : > { %3211 = vmatprep.subr.mxu0 %v1953_v54  ;;  %p3601_p6 = pnand %p3600_p7, %p3594_p3 }
 0x9bd   : > { %3212 = vmatpush3.msra.mxu0 %v1953_v54  ;;  %v2118_v54 = vld [vmem:[#allocation11 + $0xd8] sm:$0xff] }
 0x9be   : > { %2254 = vmatprep.subr.mxu0 %v2154_v9  ;;  %v2099_v9 = vld [vmem:[#allocation11 + $0x40] sm:$0xff] }
 0xa2d   : > { %v3179_v43 = vpop.f32.mrf.mxu1  ;;  %v1861_v44 = vpop.xlane.xlu1 %1860 }
 0xa2e   : > { %3369 = vrcp.f32 %v1861_v44  ;;  %v2124_v44 = vld [vmem:[#allocation11 + $0x108] sm:$0xff] }
 0xa2f   : > { %v1653_v45 = vpop.f32.mrf.mxu1 }
 0xa30   : > { %3188 = vmatprep.mubr.msk.f32.mxu1 %vm886_vm0, %v1653_v45  ;;  %v2126_v45 = vld [vmem:[#allocation11 + $0x118] sm:$0xff] }
 0xa31   : > { %3189 = vmatmul.mubr.msk.f32.vlgmr.msra.gmra.mxu1 %vm886_vm0, %v3179_v43  ;;  %v1867_v47 = vpop.permute.xlu1 %1866  ;;  %v2129_v43 = vld [vmem:[#allocation11 + $0x130] sm:$0xff] }
 0xa32   : > { %3199 = vmatpush3.msra.mxu1 %v1869_v39  ;;  %3202 = vmatprep.mubr.msk.f32.mxu1 %vm978_vm2, %v1863_v46  ;;  %v2133_v39 = vld [vmem:[#allocation11 + $0x150] sm:$0xff]  ;;  %v2123_v46 = vld [vmem:[#allocation11 + $0x100] sm:$0xff] }
 0xa33   : > { %3200 = vmatprep.subr.mxu1 %v1867_v47 }
 0xa34   : > { %3201 = vmatpush3.msra.mxu1 %v1867_v47  ;;  %v2125_v47 = vld [vmem:[#allocation11 + $0x110] sm:$0xff] }
 0xa35   : > { %2177 = vmatprep.subr.mxu1 %v2152_v8  ;;  %v2102_v8 = vld [vmem:[#allocation11 + $0x58] sm:$0xff] }
 0xa3b   : > { %v3370_v50 = vpop.eup %3369 }
 0xa3c   : > { %v1865_v51 = vmul.f32 %v3370_v50, %v3366_v40  ;;  %v2128_v40 = vld [vmem:[#allocation11 + $0x128] sm:$0xff] }
 0xa3d   : > { %v2120_v50 = vld [vmem:[#allocation11 + $0xe8] sm:$0xff] }
 0xa3e   : > { %3203 = vmatmul.mubr.msk.f32.vlgmr.msra.gmra.mxu1 %vm978_vm2, %v1865_v51  ;;  %v2122_v51 = vld [vmem:[#allocation11 + $0xf8] sm:$0xff] }
 0xa3f   : > { %2178 = vmatpush1.msra.mxu1 %v2151_v10  ;;  %v2101_v10 = vld [vmem:[#allocation11 + $0x50] sm:$0xff] }
 0xa40   : > { %2179 = vmatprep.subr.mxu1 %v2148_v12  ;;  %v2098_v12 = vld [vmem:[#allocation11 + $0x38] sm:$0xff] }
 0xa41   : > { %2180 = vmatpush1.msra.mxu1 %v2147_v14  ;;  %v2097_v14 = vld [vmem:[#allocation11 + $0x30] sm:$0xff] }
 0xa42   : > { %2181 = vmatprep.subr.mxu1 %v2144_v16  ;;  %v2094_v16 = vld [vmem:[#allocation11 + $0x18] sm:$0xff] }
 0xaf1   : > { %v3190_v56 = vpop.f32.mrf.mxu1 }
 0xaf2   : > { %v1748_v60 = vadd.f32 %v3190_v56, %v1455_v55  ;;  %v2115_v55 = vld [vmem:[#allocation11 + $0xc0] sm:$0xff]  ;;  %v2117_v56 = vld [vmem:[#allocation11 + $0xd0] sm:$0xff] }
 0xaf3   : > { %v1738_v61 = vpop.f32.mrf.mxu1 }
 0xaf4   : > { %v1747_v62 = vadd.f32 %v1738_v61, %v1450_v57  ;;  %v2112_v57 = vld [vmem:[#allocation11 + $0xa8] sm:$0xff]  ;;  %v2111_v61 = vld [vmem:[#allocation11 + $0xa0] sm:$0xff] }
 0xafe   : > { %v3204_v63 = vpop.f32.mrf.mxu1 }
 0xb00   : > { %v1944_v2 = vpop.f32.mrf.mxu1 }
 0xb01   : > { %3213 = vmatprep.mubr.msk.f32.mxu0 %vm886_vm0, %v1944_v2  ;;  %v2110_v2 = vld [vmem:[#allocation11 + $0x98] sm:$0xff] }
 0xb02   : > { %3214 = vmatmul.mubr.msk.f32.vlgmr.msra.gmra.mxu0 %vm886_vm0, %v3204_v63  ;;  %v2108_v63 = vld [vmem:[#allocation11 + $0x88] sm:$0xff] }
 0xb03   : > { %2255 = vmatpush1.msra.mxu0 %v2153_v11  ;;  %v2096_v11 = vld [vmem:[#allocation11 + $0x28] sm:$0xff] }
 0xb04   : > { %2256 = vmatprep.subr.mxu0 %v2150_v13  ;;  %v2095_v13 = vld [vmem:[#allocation11 + $0x20] sm:$0xff] }
 0xbc2   : > { %v3215_v3 = vpop.f32.mrf.mxu0 }
 0xbc3   : > { %v2039_v5 = vadd.f32 %v3215_v3, %v1748_v60  ;;  %v2114_v60 = vld [vmem:[#allocation11 + $0xb8] sm:$0xff]  ;;  %v2107_v3 = vld [vmem:[#allocation11 + $0x80] sm:$0xff] }
 0xbc4   : > { %v2029_v48 = vpop.f32.mrf.mxu0 }
 0xbc5   : > { %v2048_v58 = vadd.f32 %v2814_v4, %v2039_v5  ;;  %v2038_v6 = vadd.f32 %v2029_v48, %v1747_v62  ;;  %v2113_v62 = vld [vmem:[#allocation11 + $0xb0] sm:$0xff]  ;;  %v2104_v5 = vld [vmem:[#allocation11 + $0x68] sm:$0xff]  ;;  %v2106_v48 = vld [vmem:[#allocation11 + $0x78] sm:$0xff] }
 0xbc7   : > { %v2047_v7 = vadd.f32 %v2814_v4, %v2038_v6  ;;  %v4157_v49 = vadd.f32 %v2048_v58, %v3968_v1  ;;  %v2149_v1 = vld [vmem:[#allocation11 + $0x1d0] sm:$0xff]  ;;  %v2103_v58 = vld [vmem:[#allocation11 + $0x60] sm:$0xff] }
 0xbc8   : > { %2257 = vmatpush1.msra.mxu0 %v2149_v1  ;;  %v2109_v4 = vld [vmem:[#allocation11 + $0x90] sm:$0xff]  ;;  %v2092_v1 = vld [vmem:[#allocation11 + $0x8] sm:$0xff] }
 0xbc9   : > { %2053 = vadd.xlane.f32.xlu0 %v4157_v49  ;;  %v4161_v59 = vadd.f32 %v2047_v7, %v3965_v0  ;;  %v2143_v0 = vld [vmem:[#allocation11 + $0x1a0] sm:$0xff]  ;;  %2258 = vmatprep.subr.mxu0 %v2146_v17  ;;  %v2105_v6 = vld [vmem:[#allocation11 + $0x70] sm:$0xff]  ;;  %v2100_v7 = vld [vmem:[#allocation11 + $0x48] sm:$0xff] }
 0xbca   : > { %2182 = vmatpush1.msra.mxu1 %v2143_v0  ;;  %2259 = vmatpush1.msra.mxu0 %v2145_v18  ;;  %v2091_v17 = vld [vmem:[#allocation11] sm:$0xff]  ;;  %v2093_v0 = vld [vmem:[#allocation11 + $0x10] sm:$0xff]  ;;  %v3685_v18 = vmov 0.0  }
 0xbcb   : > { %2051 = vadd.xlane.f32.xlu1 %v4161_v59  ;;  %2183 = vmatprep.subr.mxu1 %v2140_v29 }
 0xbcc   : > { %2260 = vmatprep.subr.mxu0 %v2142_v30  ;;  %2184 = vmatpush1.msra.mxu1 %v2139_v33 }
 0xbcd   : > { %2261 = vmatpush1.msra.mxu0 %v2141_v34  ;;  %2185 = vmatprep.subr.mxu1 %v2136_v35  ;;  %v2815_v35 = vld [vmem:[%s4268_s7] ss:$0 sm:$0xff] }
 0xbce   : > { %2262 = vmatprep.subr.mxu0 %v2138_v24  ;;  %2186 = vmatpush1.msra.mxu1 %v2135_v36  ;;  %v2816_v36 = vld [vmem:[%s4269_s8] ss:$0 sm:$0xff] }
 0xbcf   : > { %2263 = vmatpush1.msra.mxu0 %v2137_v15  ;;  %2187 = vmatprep.subr.mxu1 %v2132_v37 }
 0xbd0   : > { %2264 = vmatprep.subr.mxu0 %v2134_v19  ;;  %2188 = vmatpush1.msra.mxu1 %v2131_v38  ;;  %v2402_v38 = vld [vmem:[#allocation13 + $0x78] sm:$0xff] }
 0xbd1   : > { %2265 = vmatpush1.msra.mxu0 %v2133_v39  ;;  %2189 = vmatprep.subr.mxu1 %v2128_v40  ;;  %v2434_v39 = vld [vmem:[#allocation13 + $0x178] sm:$0xff]  ;;  %v2417_v40 = vld [vmem:[#allocation13 + $0xf0] sm:$0xff] }
 0xbd2   : > { %2266 = vmatprep.subr.mxu0 %v2130_v41  ;;  %2190 = vmatpush1.msra.mxu1 %v2127_v42  ;;  %v2449_v41 = vld [vmem:[#allocation13 + $0x1f0] sm:$0xff] }
 0xbd3   : > { %2267 = vmatpush1.msra.mxu0 %v2129_v43  ;;  %2191 = vmatprep.subr.mxu1 %v2124_v44  ;;  %v2401_v42 = vld [vmem:[#allocation13 + $0x70] sm:$0xff]  ;;  %v2416_v44 = vld [vmem:[#allocation13 + $0xe8] sm:$0xff] }
 0xbd4   : > { %2268 = vmatprep.subr.mxu0 %v2126_v45  ;;  %2192 = vmatpush1.msra.mxu1 %v2123_v46  ;;  %v2433_v43 = vld [vmem:[#allocation13 + $0x170] sm:$0xff]  ;;  %v2448_v45 = vld [vmem:[#allocation13 + $0x1e8] sm:$0xff] }
 0xbd5   : > { %2269 = vmatpush1.msra.mxu0 %v2125_v47  ;;  %2193 = vmatprep.subr.mxu1 %v2120_v50  ;;  %v2400_v46 = vld [vmem:[#allocation13 + $0x68] sm:$0xff]  ;;  %v2415_v50 = vld [vmem:[#allocation13 + $0xe0] sm:$0xff] }
 0xbd6   : > { %2270 = vmatprep.subr.mxu0 %v2122_v51  ;;  %2194 = vmatpush1.msra.mxu1 %v2119_v26  ;;  %v2432_v47 = vld [vmem:[#allocation13 + $0x168] sm:$0xff]  ;;  %v2447_v51 = vld [vmem:[#allocation13 + $0x1e0] sm:$0xff] }
 0xbd7   : > { %2271 = vmatpush1.msra.mxu0 %v2121_v52  ;;  %2195 = vmatprep.subr.mxu1 %v2116_v53  ;;  %v2399_v26 = vld [vmem:[#allocation13 + $0x60] sm:$0xff]  ;;  %v2414_v53 = vld [vmem:[#allocation13 + $0xd8] sm:$0xff] }
 0xbd8   : > { %2272 = vmatprep.subr.mxu0 %v2118_v54  ;;  %2196 = vmatpush1.msra.mxu1 %v2115_v55  ;;  %v2431_v52 = vld [vmem:[#allocation13 + $0x160] sm:$0xff]  ;;  %v2446_v54 = vld [vmem:[#allocation13 + $0x1d8] sm:$0xff] }
 0xbd9   : > { %2273 = vmatpush1.msra.mxu0 %v2117_v56  ;;  %2197 = vmatprep.subr.mxu1 %v2112_v57  ;;  %v2398_v55 = vld [vmem:[#allocation13 + $0x58] sm:$0xff]  ;;  %v2413_v57 = vld [vmem:[#allocation13 + $0xd0] sm:$0xff] }
 0xbda   : > { %2274 = vmatprep.subr.mxu0 %v2114_v60  ;;  %2198 = vmatpush1.msra.mxu1 %v2111_v61  ;;  %v2430_v56 = vld [vmem:[#allocation13 + $0x158] sm:$0xff]  ;;  %v2445_v60 = vld [vmem:[#allocation13 + $0x1d0] sm:$0xff] }
 0xbdb   : > { %2275 = vmatpush1.msra.mxu0 %v2113_v62  ;;  %2199 = vmatprep.subr.mxu1 %v2108_v63  ;;  %v2397_v61 = vld [vmem:[#allocation13 + $0x50] sm:$0xff]  ;;  %v2412_v63 = vld [vmem:[#allocation13 + $0xc8] sm:$0xff] }
 0xbdc   : > { %2276 = vmatprep.subr.mxu0 %v2110_v2  ;;  %2200 = vmatpush1.msra.mxu1 %v2107_v3  ;;  %v2429_v62 = vld [vmem:[#allocation13 + $0x150] sm:$0xff]  ;;  %v2444_v2 = vld [vmem:[#allocation13 + $0x1c8] sm:$0xff] }
 0xbdd   : > { %2277 = vmatpush1.msra.mxu0 %v2109_v4  ;;  %2201 = vmatprep.subr.mxu1 %v2104_v5  ;;  %v2396_v3 = vld [vmem:[#allocation13 + $0x48] sm:$0xff]  ;;  %v2411_v5 = vld [vmem:[#allocation13 + $0xc0] sm:$0xff] }
 0xbde   : > { %2278 = vmatprep.subr.mxu0 %v2106_v48  ;;  %2202 = vmatpush1.msra.mxu1 %v2103_v58  ;;  %v2428_v4 = vld [vmem:[#allocation13 + $0x148] sm:$0xff]  ;;  %v2443_v48 = vld [vmem:[#allocation13 + $0x1c0] sm:$0xff] }
 0xbdf   : > { %2279 = vmatpush1.msra.mxu0 %v2105_v6  ;;  %2203 = vmatprep.subr.mxu1 %v2100_v7  ;;  %v2395_v58 = vld [vmem:[#allocation13 + $0x40] sm:$0xff]  ;;  %v2410_v7 = vld [vmem:[#allocation13 + $0xb8] sm:$0xff] }
 0xbe0   : > { %2280 = vmatprep.subr.mxu0 %v2102_v8  ;;  %2204 = vmatpush1.msra.mxu1 %v2099_v9  ;;  %v2427_v6 = vld [vmem:[#allocation13 + $0x140] sm:$0xff]  ;;  %v2442_v8 = vld [vmem:[#allocation13 + $0x1b8] sm:$0xff] }
 0xbe1   : > { %2281 = vmatpush1.msra.mxu0 %v2101_v10  ;;  %2205 = vmatprep.subr.mxu1 %v2096_v11  ;;  %v2394_v9 = vld [vmem:[#allocation13 + $0x38] sm:$0xff]  ;;  %v2409_v11 = vld [vmem:[#allocation13 + $0xb0] sm:$0xff] }
 0xbe2   : > { %2282 = vmatprep.subr.mxu0 %v2098_v12  ;;  %2206 = vmatpush1.msra.mxu1 %v2095_v13  ;;  %v2426_v10 = vld [vmem:[#allocation13 + $0x138] sm:$0xff]  ;;  %v2441_v12 = vld [vmem:[#allocation13 + $0x1b0] sm:$0xff] }
 0xbe3   : > { %2283 = vmatpush1.msra.mxu0 %v2097_v14  ;;  %2207 = vmatprep.subr.mxu1 %v2092_v1  ;;  %v2393_v13 = vld [vmem:[#allocation13 + $0x30] sm:$0xff]  ;;  %v2408_v1 = vld [vmem:[#allocation13 + $0xa8] sm:$0xff] }
 0xbe4   : > { %2284 = vmatprep.subr.mxu0 %v2094_v16  ;;  %2208 = vmatpush1.msra.mxu1 %v2091_v17  ;;  %v2425_v14 = vld [vmem:[#allocation13 + $0x130] sm:$0xff]  ;;  %v2440_v16 = vld [vmem:[#allocation13 + $0x1a8] sm:$0xff] }
 0xbe5   : > { %2241 = vmatprep.mubr.f32.mxu1 %v3685_v18  ;;  %2285 = vmatpush1.msra.mxu0 %v2093_v0  ;;  %v2392_v17 = vld [vmem:[#allocation13 + $0x28] sm:$0xff] }
 0xbe6   : > { %2318 = vmatprep.mubr.f32.mxu0 %v3685_v18  ;;  %v2424_v0 = vld [vmem:[#allocation13 + $0x128] sm:$0xff] }
 0xc52   : > { %v2054_v22 = vpop.xlane.xlu0 %2053 }
 0xc53   : > { %v2056_v23 = vmul.f32 0.0078125, %v2054_v22 }
 0xc54   : > { %v2052_v25 = vpop.xlane.xlu1 %2051 }
 0xc55   : > { %v4165_v20 = vsub.f32 %v4157_v49, %v2056_v23  ;;  %v2055_v21 = vmul.f32 0.0078125, %v2052_v25 }
 0xc57   : > { %v4168_v27 = vsub.f32 %v4161_v59, %v2055_v21  ;;  %v2060_v31 = vmul.f32 %v4165_v20, %v4165_v20 }
 0xc59   : > { %2063 = vadd.xlane.f32.xlu1 %v2060_v31  ;;  %v2059_v32 = vmul.f32 %v4168_v27, %v4168_v27 }
 0xc5b   : > { %2061 = vadd.xlane.f32.xlu0 %v2059_v32 }
 0xce2   : > { %v2064_v22 = vpop.xlane.xlu1 %2063 }
 0xce3   : > { %v2066_v23 = vmul.f32 0.0078125, %v2064_v22  ;;  %v2439_v22 = vld [vmem:[#allocation13 + $0x1a0] sm:$0xff] }
 0xce4   : > { %v2062_v25 = vpop.xlane.xlu0 %2061 }
 0xce5   : > { %v2068_v21 = vadd.f32 1e-05, %v2066_v23  ;;  %v2065_v31 = vmul.f32 0.0078125, %v2062_v25  ;;  %v2391_v23 = vld [vmem:[#allocation13 + $0x20] sm:$0xff] }
 0xce6   : > { %v2423_v25 = vld [vmem:[#allocation13 + $0x120] sm:$0xff] }
 0xce7   : > { %3371 = vrsqrt.f32 %v2068_v21  ;;  %v2067_v32 = vadd.f32 1e-05, %v2065_v31  ;;  %v2406_v21 = vld [vmem:[#allocation13 + $0x98] sm:$0xff] }
 0xce8   : > { %v2438_v31 = vld [vmem:[#allocation13 + $0x198] sm:$0xff] }
 0xce9   : > { %3373 = vrsqrt.f32 %v2067_v32  ;;  %v2390_v32 = vld [vmem:[#allocation13 + $0x18] sm:$0xff] }
 0xcf4   : > { %v3372_v29 = vpop.eup %3371 }
 0xcf5   : > { %v2072_v34 = vmul.f32 %v3372_v29, %v4165_v20  ;;  %v2450_v20 = vld [vmem:[#allocation13 + $0x1f8] sm:$0xff] }
 0xcf6   : > { %v3374_v30 = vpop.eup %3373  ;;  %2973 = vmatprep.subr.mxu0 %v2450_v20  ;;  %v2422_v29 = vld [vmem:[#allocation13 + $0x118] sm:$0xff]  ;;  %v2387_v20 = vld [vmem:[#allocation13] sm:$0xff] }
 0xcf7   : > { %v2071_v33 = vmul.f32 %v3374_v30, %v4168_v27  ;;  %v2081_v37 = vmul.f32 %v2815_v35, %v2072_v34  ;;  %v2418_v27 = vld [vmem:[#allocation13 + $0xf8] sm:$0xff]  ;;  %v2405_v30 = vld [vmem:[#allocation13 + $0x90] sm:$0xff] }
 0xcf8   : > { %2935 = vmatprep.subr.mxu1 %v2418_v27  ;;  %v2389_v34 = vld [vmem:[#allocation13 + $0x10] sm:$0xff]  ;;  %v2435_v27 = vld [vmem:[#allocation13 + $0x180] sm:$0xff] }
 0xcf9   : > { %v2080_v24 = vmul.f32 %v2815_v35, %v2071_v33  ;;  %v2090_v19 = vadd.f32 %v2816_v36, %v2081_v37  ;;  %v2437_v33 = vld [vmem:[#allocation13 + $0x190] sm:$0xff]  ;;  %v2420_v37 = vld [vmem:[#allocation13 + $0x108] sm:$0xff] }
 0xcfa   : > { %v2421_v35 = vld [vmem:[#allocation13 + $0x110] sm:$0xff] }
 0xcfb   : > { %v2089_v15 = vadd.f32 %v2816_v36, %v2080_v24  ;;  %v2404_v24 = vld [vmem:[#allocation13 + $0x88] sm:$0xff] }
 0xcfc   : > { %v2436_v36 = vld [vmem:[#allocation13 + $0x188] sm:$0xff] }
 0xcfd   : > { %2242 = vmatmul.mubr.f32.vlgmr.msra.gmra.mxu1 %v2089_v15  ;;  %2319 = vmatmul.mubr.f32.vlgmr.msra.gmra.mxu0 %v2089_v15  ;;  %v2388_v15 = vld [vmem:[#allocation13 + $0x8] sm:$0xff] }
 0xcfe   : > { %2247 = vmatprep.mubr.f32.mxu1 %v3685_v18  ;;  %2324 = vmatprep.mubr.f32.mxu0 %v3685_v18  ;;  %v2407_v18 = vld [vmem:[#allocation13 + $0xa0] sm:$0xff] }
 0xcff   : > { %2936 = vmatpush3.msra.mxu1 %v2402_v38  ;;  %2974 = vmatpush3.msra.mxu0 %v2434_v39  ;;  %v2419_v38 = vld [vmem:[#allocation13 + $0x100] sm:$0xff]  ;;  %v2159_v39 = vsub.s32 0, %v4020_v28 }
 0xd00   : > { %2937 = vmatprep.subr.mxu1 %v2417_v40  ;;  %2975 = vmatprep.subr.mxu0 %v2449_v41  ;;  %v2167_v40 = vsub.s32 2, %v4020_v28  ;;  %v2155_v41 = vld [vmem:[%s4271_s10] sm:$0xf] }
 0xd01   : > { %2248 = vmatmul.mubr.f32.gmra.mxu1 %v2090_v19  ;;  %2325 = vmatmul.mubr.f32.gmra.mxu0 %v2090_v19  ;;  %v2403_v19 = vld [vmem:[#allocation13 + $0x80] sm:$0xff] }
 0xd02   : > { %2938 = vmatpush3.msra.mxu1 %v2401_v42  ;;  %2976 = vmatpush3.msra.mxu0 %v2433_v43  ;;  %v2163_v42 = vsub.s32 1, %v4020_v28  ;;  %v2171_v43 = vsub.s32 3, %v4020_v28 }
 0xd03   : > { %2939 = vmatprep.subr.mxu1 %v2416_v44  ;;  %2977 = vmatprep.subr.mxu0 %v2448_v45  ;;  %v2160_v44 = vrot.slane %v2155_v41, %v2159_v39  ;;  %v2168_v45 = vrot.slane %v2155_v41, %v2167_v40 }
 0xd04   : > { %2940 = vmatpush3.msra.mxu1 %v2400_v46  ;;  %2978 = vmatpush3.msra.mxu0 %v2432_v47  ;;  %v2164_v46 = vrot.slane %v2155_v41, %v2163_v42  ;;  %v2172_v47 = vrot.slane %v2155_v41, %v2171_v43 }
 0xd05   : > { %2941 = vmatprep.subr.mxu1 %v2415_v50  ;;  %2979 = vmatprep.subr.mxu0 %v2447_v51 }
 0xd06   : > { %2942 = vmatpush3.msra.mxu1 %v2399_v26  ;;  %2980 = vmatpush3.msra.mxu0 %v2431_v52 }
 0xd07   : > { %2943 = vmatprep.subr.mxu1 %v2414_v53  ;;  %2981 = vmatprep.subr.mxu0 %v2446_v54 }
 0xd08   : > { %2944 = vmatpush3.msra.mxu1 %v2398_v55  ;;  %2982 = vmatpush3.msra.mxu0 %v2430_v56 }
 0xd09   : > { %2945 = vmatprep.subr.mxu1 %v2413_v57  ;;  %2983 = vmatprep.subr.mxu0 %v2445_v60 }
 0xd0a   : > { %2946 = vmatpush3.msra.mxu1 %v2397_v61  ;;  %2984 = vmatpush3.msra.mxu0 %v2429_v62 }
 0xd0b   : > { %2947 = vmatprep.subr.mxu1 %v2412_v63  ;;  %2985 = vmatprep.subr.mxu0 %v2444_v2 }
 0xd0c   : > { %2948 = vmatpush3.msra.mxu1 %v2396_v3  ;;  %2986 = vmatpush3.msra.mxu0 %v2428_v4 }
 0xd0d   : > { %2949 = vmatprep.subr.mxu1 %v2411_v5  ;;  %2987 = vmatprep.subr.mxu0 %v2443_v48 }
 0xd0e   : > { %2950 = vmatpush3.msra.mxu1 %v2395_v58  ;;  %2988 = vmatpush3.msra.mxu0 %v2427_v6 }
 0xd0f   : > { %2951 = vmatprep.subr.mxu1 %v2410_v7  ;;  %2989 = vmatprep.subr.mxu0 %v2442_v8 }
 0xd10   : > { %2952 = vmatpush3.msra.mxu1 %v2394_v9  ;;  %2990 = vmatpush3.msra.mxu0 %v2426_v10 }
 0xd11   : > { %2953 = vmatprep.subr.mxu1 %v2409_v11  ;;  %2991 = vmatprep.subr.mxu0 %v2441_v12 }
 0xd12   : > { %2954 = vmatpush3.msra.mxu1 %v2393_v13  ;;  %2992 = vmatpush3.msra.mxu0 %v2425_v14 }
 0xd13   : > { %2955 = vmatprep.subr.mxu1 %v2408_v1  ;;  %2993 = vmatprep.subr.mxu0 %v2440_v16 }
 0xd14   : > { %2956 = vmatpush3.msra.mxu1 %v2392_v17  ;;  %2994 = vmatpush3.msra.mxu0 %v2424_v0 }
 0xd15   : > { %2957 = vmatprep.subr.mxu1 %v2407_v18  ;;  %2995 = vmatprep.subr.mxu0 %v2439_v22 }
 0xd16   : > { %2958 = vmatpush3.msra.mxu1 %v2391_v23  ;;  %2996 = vmatpush3.msra.mxu0 %v2423_v25 }
 0xd17   : > { %2959 = vmatprep.subr.mxu1 %v2406_v21  ;;  %2997 = vmatprep.subr.mxu0 %v2438_v31 }
 0xd18   : > { %2960 = vmatpush3.msra.mxu1 %v2390_v32  ;;  %2998 = vmatpush3.msra.mxu0 %v2422_v29 }
 0xd19   : > { %2961 = vmatprep.subr.mxu1 %v2405_v30  ;;  %2999 = vmatprep.subr.mxu0 %v2437_v33 }
 0xd1a   : > { %2962 = vmatpush3.msra.mxu1 %v2389_v34  ;;  %3000 = vmatpush3.msra.mxu0 %v2421_v35 }
 0xd1b   : > { %2963 = vmatprep.subr.mxu1 %v2404_v24  ;;  %3001 = vmatprep.subr.mxu0 %v2436_v36 }
 0xd1c   : > { %2964 = vmatpush3.msra.mxu1 %v2388_v15  ;;  %3002 = vmatpush3.msra.mxu0 %v2420_v37 }
 0xd1d   : > { %2965 = vmatprep.subr.mxu1 %v2403_v19  ;;  %3003 = vmatprep.subr.mxu0 %v2435_v27 }
 0xd1e   : > { %2966 = vmatpush3.msra.mxu1 %v2387_v20  ;;  %3004 = vmatpush3.msra.mxu0 %v2419_v38 }
 0xdbd   : > { %v2243_v50 = vpop.f32.mrf.mxu1  ;;  %v2320_v51 = vpop.f32.mrf.mxu0 }
 0xdbe   : > { %v4189_v26 = vadd.f32 %v2243_v50, %v2160_v44  ;;  %v4191_v52 = vadd.f32 %v2320_v51, %v2168_v45 }
 0xdbf   : > { %v2245_v53 = vpop.f32.mrf.mxu1  ;;  %v2322_v54 = vpop.f32.mrf.mxu0 }
 0xdc0   : > { %v2331_v55 = vmul.f32 -1.702, %v4189_v26  ;;  %v2333_v56 = vmul.f32 -1.702, %v4191_v52  ;;  %v2246_v57 = vadd.f32 %v2245_v53, %v2164_v46  ;;  %v2323_v60 = vadd.f32 %v2322_v54, %v2172_v47 }
 0xdc1   : > { %v2249_v61 = vpop.f32.mrf.mxu1  ;;  %v2326_v28 = vpop.f32.mrf.mxu0 }
 0xdc2   : > { %v2339_v62 = vmul.f32 1.442695, %v2331_v55  ;;  %v2343_v63 = vmul.f32 1.442695, %v2333_v56  ;;  %v2332_v2 = vmul.f32 -1.702, %v2246_v57  ;;  %v4195_v3 = vadd.f32 %v2249_v61, %v2160_v44 }
 0xdc3   : > { %v2334_v4 = vmul.f32 -1.702, %v2323_v60  ;;  %v4197_v5 = vadd.f32 %v2326_v28, %v2168_v45  ;;  %v2251_v48 = vpop.f32.mrf.mxu1  ;;  %v2328_v58 = vpop.f32.mrf.mxu0 }
 0xdc4   : > { %3375 = vpow2.f32 %v2339_v62  ;;  %v2341_v6 = vmul.f32 1.442695, %v2332_v2  ;;  %v2335_v7 = vmul.f32 -1.702, %v4195_v3  ;;  %v2252_v8 = vadd.f32 %v2251_v48, %v2164_v46 }
 0xdc5   : > { %3377 = vpow2.f32 %v2343_v63  ;;  %v2345_v9 = vmul.f32 1.442695, %v2334_v4  ;;  %v2337_v10 = vmul.f32 -1.702, %v4197_v5  ;;  %v2329_v11 = vadd.f32 %v2328_v58, %v2172_v47 }
 0xdc6   : > { %3379 = vpow2.f32 %v2341_v6  ;;  %v2347_v12 = vmul.f32 1.442695, %v2335_v7  ;;  %v2336_v13 = vmul.f32 -1.702, %v2252_v8 }
 0xdc7   : > { %3381 = vpow2.f32 %v2345_v9  ;;  %v2351_v14 = vmul.f32 1.442695, %v2337_v10  ;;  %v2338_v1 = vmul.f32 -1.702, %v2329_v11 }
 0xdc8   : > { %3383 = vpow2.f32 %v2347_v12  ;;  %v2349_v16 = vmul.f32 1.442695, %v2336_v13 }
 0xdc9   : > { %3385 = vpow2.f32 %v2351_v14  ;;  %v2353_v17 = vmul.f32 1.442695, %v2338_v1 }
 0xdca   : > { %3387 = vpow2.f32 %v2349_v16 }
 0xdcb   : > { %3389 = vpow2.f32 %v2353_v17 }
 0xdd1   : > { %v3376_v0 = vpop.eup %3375 }
 0xdd2   : > { %v3378_v18 = vpop.eup %3377  ;;  %v2355_v22 = vadd.f32 1.0, %v3376_v0 }
 0xdd3   : > { %v3380_v23 = vpop.eup %3379  ;;  %v2357_v25 = vadd.f32 1.0, %v3378_v18 }
 0xdd4   : > { %v3382_v21 = vpop.eup %3381  ;;  %3391 = vrcp.f32 %v2355_v22  ;;  %v2356_v31 = vadd.f32 1.0, %v3380_v23 }
 0xdd5   : > { %v3384_v32 = vpop.eup %3383  ;;  %3393 = vrcp.f32 %v2357_v25  ;;  %v2358_v29 = vadd.f32 1.0, %v3382_v21 }
 0xdd6   : > { %v3386_v30 = vpop.eup %3385  ;;  %3395 = vrcp.f32 %v2356_v31  ;;  %v2359_v33 = vadd.f32 1.0, %v3384_v32 }
 0xdd7   : > { %v3388_v34 = vpop.eup %3387  ;;  %3397 = vrcp.f32 %v2358_v29  ;;  %v2361_v35 = vadd.f32 1.0, %v3386_v30 }
 0xdd8   : > { %v3390_v24 = vpop.eup %3389  ;;  %3399 = vrcp.f32 %v2359_v33  ;;  %v2360_v36 = vadd.f32 1.0, %v3388_v34 }
 0xdd9   : > { %3401 = vrcp.f32 %v2361_v35  ;;  %v2362_v15 = vadd.f32 1.0, %v3390_v24 }
 0xdda   : > { %3403 = vrcp.f32 %v2360_v36 }
 0xddb   : > { %3405 = vrcp.f32 %v2362_v15 }
 0xde1   : > { %v3392_v37 = vpop.eup %3391 }
 0xde2   : > { %v3394_v19 = vpop.eup %3393  ;;  %v2379_v40 = vmul.f32 %v3392_v37, %v4189_v26 }
 0xde3   : > { %v3396_v27 = vpop.eup %3395  ;;  %v2381_v43 = vmul.f32 %v3394_v19, %v4191_v52  ;;  %v2817_v52 = vld [vmem:[%s4273_s12] ss:$0 sm:$0xff] }
 0xde4   : > { %v3398_v20 = vpop.eup %3397  ;;  %v2380_v38 = vmul.f32 %v3396_v27, %v2246_v57 }
 0xde5   : > { %v3400_v39 = vpop.eup %3399  ;;  %v2382_v41 = vmul.f32 %v3398_v20, %v2323_v60 }
 0xde6   : > { %v3402_v42 = vpop.eup %3401  ;;  %2522 = vmatprep.mubr.f32.mxu1 %v2380_v38  ;;  %v2383_v47 = vmul.f32 %v3400_v39, %v4195_v3 }
 0xde7   : > { %v3404_v44 = vpop.eup %3403  ;;  %2597 = vmatprep.mubr.f32.mxu0 %v2382_v41  ;;  %2523 = vmatmul.mubr.f32.vlgmr.msra.gmra.mxu1 %v2379_v40  ;;  %v2385_v51 = vmul.f32 %v3402_v42, %v4197_v5 }
 0xde8   : > { %v3406_v45 = vpop.eup %3405  ;;  %v2384_v46 = vmul.f32 %v3404_v44, %v2252_v8  ;;  %2598 = vmatmul.mubr.f32.vlgmr.msra.gmra.mxu0 %v2381_v43 }
 0xde9   : > { %v2386_v50 = vmul.f32 %v3406_v45, %v2329_v11 }
 0xdea   : > { %2527 = vmatprep.mubr.f32.mxu1 %v2384_v46 }
 0xdeb   : > { %2602 = vmatprep.mubr.f32.mxu0 %v2386_v50  ;;  %2528 = vmatmul.mubr.f32.gmra.mxu1 %v2383_v47 }
 0xdec   : > { %2603 = vmatmul.mubr.f32.gmra.mxu0 %v2385_v51 }
 0xea7   : > { %v2967_v26 = vpop.f32.mrf.mxu1 }
 0xea8   : > { %v3005_v53 = vpop.f32.mrf.mxu0 }
 0xea9   : > { %v2968_v54 = vpop.f32.mrf.mxu1 }
 0xeaa   : > { %v2969_v55 = vadd.f32 %v2968_v54, %v2967_v26  ;;  %v3006_v56 = vpop.f32.mrf.mxu0 }
 0xeab   : > { %v2970_v57 = vpop.f32.mrf.mxu1  ;;  %v3007_v61 = vadd.f32 %v3006_v56, %v3005_v53 }
 0xeac   : > { %v2525_v60 = vadd.f32 %v2969_v55, %v2817_v52  ;;  %v3008_v28 = vpop.f32.mrf.mxu0 }
 0xead   : > { %v2971_v62 = vpop.f32.mrf.mxu1 }
 0xeae   : > { %v2600_v63 = vadd.f32 %v3007_v61, %v2525_v60  ;;  %v2972_v2 = vadd.f32 %v2971_v62, %v2970_v57  ;;  %v3009_v3 = vpop.f32.mrf.mxu0 }
 0xeaf   : > { %v3010_v48 = vadd.f32 %v3009_v3, %v3008_v28 }
 0xeb0   : > { %v2608_v4 = vadd.f32 %v2600_v63, %v4161_v59  ;;  %v2530_v5 = vadd.f32 %v2972_v2, %v2817_v52 }
 0xeb2   : > { %2610 = vst [vmem:[%s541_s17] sm:$0xff] %v2608_v4  ;;  %v2605_v58 = vadd.f32 %v3010_v48, %v2530_v5 }
 0xeb4   : > { %v2609_v6 = vadd.f32 %v2605_v58, %v4157_v49 }
 0xeb6   : > { %2611 = vst [vmem:[%s541_s17 + $0x8] sm:$0xff] %v2609_v6 }
 0xeb7   : > { %3604 = shalt.err (!%p3601_p6)
}
 0xeb8   : > { %s3605_s15 = scalar_lea.hbm %s4217_s29, 256  ;;  %s3609_s18 = scalar_lea.hbm %s4274_s13, 512 }
 0xeb9   : > { %p3606_p4 = scmp.ne.s32.totalorder %s4217_s29, %s3605_s15  ;;  %p3610_p9 = scmp.lt.s32.totalorder %s4217_s29, %s4274_s13 }
 0xeba   : > { %p3611_p11 = scmp.lt.s32.totalorder %s3609_s18, %s3605_s15 }
 0xebb   : > { %p3607_p0 = pnand %p3606_p4, %p4313_p13 }
 0xebc   : > { %p3612_p10 = por %p3611_p11, %p3610_p9 }
 0xebd   : > { %p3608_p2 = pneg %p3607_p0 }
 0xebf   : > { %p3613_p12 = pnand %p3612_p10, %p3608_p2 }
 0xec1   : > { %3616 = shalt.err (!%p3613_p12)
}
 0xec2   : > { %s3687_s11 = smov 128   ;;  %s3688_s20 = smov 8  }
 0xec3   : > { %3242 = dma.vmem_to_hbm [thread:$0]  (%p4313_p13), %s4212_s22, 256, %s4217_s29, %s2613_s30, %s3687_s11, %s3687_s11, %s3688_s20  }
 0xec4 PF: > { %s2641_s5 = sand.u32 1, %s3655_s25   ;;  %p4314_p1 = scmp.ne.s32.totalorder %s4301_s1, 0 }
 0xec5   : > { %p4315_p3 = scmp.ge.s32.totalorder %s3667_s28, 2  ;;  %s2642_s14 = scalar_lea.sflag [#allocation4], %s2641_s5 }
 0xec7   : > { %p3268_p5 = pnand %p4315_p3, %p4314_p1 }
 0xec9   : > { %p3269_p8 = pneg %p3268_p5 }
 0xecb   : > { %3650 = dma.done.wait (%p3269_p8), %s2642_s14, 256  }
 0xecc   : > { %3652 = vsyncadd (%p3269_p8), %s2642_s14, 4294967040  ;;  %s4316_s2 = sld [smem:[#allocation20_spill]]  ;;  %p29_p7 = scmp.ge.s32.totalorder %s3868_s21, 4  }
 0xecd   : > { %s4317_s25 = smov %s3659_s26  ;;  %s4318_s26 = smov %s3663_s27 }
 0xece   : > { %s4320_s28 = smov %s3868_s21  ;;  %31 = sbr.rel (!%p29_p7) target bundleno = 15 (0xf), region = 141 }
 0xed2   : > { %s4319_s27 = smov %s4316_s2 }
 0xed3   :  { %2647 = vsyncpa [#allocation3], 1 }
 0xed4   :  { %2649 = vsyncpa [#allocation3 + $0x1], 1 }
 0xed5   :  { %2650 = vsyncpa [#allocation6], 1 }
 0xed6   :  { %2651 = vsyncpa [#allocation9], 1 }
 0xed7   :  { %2652 = vsyncpa [#allocation12], 1 }
 0xed8   :  { %2653 = vsyncpa [#allocation4], 1 }
 0xed9   :  { %2655 = vsyncpa [#allocation4 + $0x1], 1 }

</bundles_post_ra>
